<compile_context>
chip_gen: v5e
topology: v5e:2x2
jax: 0.10.0
libtpu: 0.0.40
codegen_flags: <defaults>
</compile_context>

<pallas_src>
import functools

import jax
import jax.numpy as jnp
import numpy as np
from jax.experimental import pallas as pl
from jax.experimental.pallas import tpu as pltpu

XG_LANES = 128  # one full lane group for the per-image global-attention vector


# ----------------------------- kernel helpers --------------------------------
def _resid_xa(x, wr, br):
    """ResidualConnection: resid = relu(bn(conv(x)) + x);  xa = x + resid. f32."""
    pre = jnp.dot(wr, x, preferred_element_type=jnp.float32) + br
    resid = jnp.maximum(pre + x, 0.0)
    return resid, x + resid


def _att_mlp(z, w1, b1, w2, b2):
    """conv-bn-relu-conv-bn (local or global attention).  bf16 MXU, f32 acc."""
    h = jnp.maximum(
        jnp.dot(w1, z.astype(w1.dtype), preferred_element_type=jnp.float32) + b1, 0.0)
    return jnp.dot(w2, h.astype(w2.dtype), preferred_element_type=jnp.float32) + b2


def _sigmoid(z):
    # sigmoid(z) == 0.5*tanh(0.5*z) + 0.5  -> single EUP transcendental.
    # TODO(synk): on v6e/v7x this (and the fuse) could run in bf16 to halve VALU work.
    return 0.5 * jnp.tanh(0.5 * z) + 0.5


# ------------------------------ Pallas kernels --------------------------------
def _aff_fused_kernel(x_ref, wr_ref, br_ref, wl1_ref, bl1_ref, wl2_ref, bl2_ref,
                      wg1_ref, bg1_ref, wg2_ref, bg2_ref, o_ref):
    """Single pass: one whole image (C, HW) per block."""
    x = x_ref[0]                                            # (C, HW) f32
    resid, xa = _resid_xa(x, wr_ref[...], br_ref[...])
    xl = _att_mlp(xa, wl1_ref[...], bl1_ref[...], wl2_ref[...], bl2_ref[...])
    m = jnp.mean(xa, axis=1, keepdims=True)                 # AdaptiveAvgPool2d(1)
    m = jnp.broadcast_to(m, (m.shape[0], XG_LANES))         # full lane group for MXU
    xg = _att_mlp(m, wg1_ref[...], bg1_ref[...], wg2_ref[...], bg2_ref[...])[:, :1]
    wei = _sigmoid(xl + xg)
    o_ref[0] = xa - resid * wei                             # == x*wei + xa*(1-wei)


def _aff_xg_kernel(x_ref, wr_ref, br_ref, wg1_ref, bg1_ref, wg2_ref, bg2_ref,
                   xg_ref, acc_ref, *, inv_hw):
    """Pass 1: per-image mean of xa (reduction over hw tiles) -> global att xg."""
    t = pl.program_id(1)

    @pl.when(t == 0)
    def _():
        acc_ref[...] = jnp.zeros_like(acc_ref)

    x = x_ref[0]                                            # (C, T) f32
    _, xa = _resid_xa(x, wr_ref[...], br_ref[...])
    acc_ref[...] += jnp.sum(xa, axis=1, keepdims=True)      # (C, 1) partial sum

    @pl.when(t == pl.num_programs(1) - 1)
    def _():
        m = acc_ref[...] * inv_hw                           # per-image mean (C, 1)
        m = jnp.broadcast_to(m, (m.shape[0], XG_LANES))
        xg_ref[0] = _att_mlp(m, wg1_ref[...], bg1_ref[...], wg2_ref[...], bg2_ref[...])


def _aff_main_kernel(x_ref, xg_ref, wr_ref, br_ref, wl1_ref, bl1_ref,
                     wl2_ref, bl2_ref, o_ref):
    """Pass 2: fully parallel over (image, hw tile); xg precomputed by pass 1."""
    x = x_ref[0]                                            # (C, T) f32
    resid, xa = _resid_xa(x, wr_ref[...], br_ref[...])
    xl = _att_mlp(xa, wl1_ref[...], bl1_ref[...], wl2_ref[...], bl2_ref[...])
    xg = xg_ref[0][:, :1]                                   # (C, 1) per image
    wei = _sigmoid(xl + xg)
    o_ref[0] = xa - resid * wei


# ------------------------------ tiling helpers --------------------------------
def _vmem_capacity_bytes():
    try:
        return int(pltpu.get_tpu_info().vmem_capacity_bytes)
    except Exception:
        return 64 * 1024 * 1024      # conservative default (v7x per-core VMEM)


def _choose_hw_tile(N, C, HW, vmem_cap):
    """Pixel (lane) tile width T for (C, T) blocks."""
    if HW % 128 != 0:
        # TODO(synk): pad / mask ragged lane tiles; for now keep whole images.
        return HW
    budget = vmem_cap // 2
    # ~10 live f32 (C,T) temporaries + double-buffered in/out blocks per step.
    t_fit = max(128, (budget // (14 * C * 4)) // 128 * 128)
    # Target >= 8 grid steps so pipeline fill/drain is amortised and the v7x
    # megacore gets a fine-grained load balance.
    t_depth = max(128, (N * HW // 8) // 128 * 128)
    t = min(HW, t_fit, t_depth, 2048)    # ~2048-lane (512 KiB) tiles saturate HBM
    while HW % t != 0:                   # keep tiles uniform (no ragged masking)
        t -= 128
    return t


# --------------------------------- wrapper ------------------------------------
def _aff_forward_impl(x_nchw, params, single_buffer_weights):
    wr, br, wl1, bl1, wl2, bl2, wg1, bg1, wg2, bg2 = params
    N, C, H, W = x_nchw.shape
    HW = H * W
    assert C % 8 == 0, "channels must be a multiple of 8 (sublane group)"

    x = x_nchw.reshape(N, C, HW)         # free view of the contiguous NCHW buffer

    vmem_cap = _vmem_capacity_bytes()
    T = _choose_hw_tile(N, C, HW, vmem_cap)
    inter = wl1.shape[0]

    def cparams(dims):
        return pltpu.CompilerParams(
            dimension_semantics=dims,
            vmem_limit_bytes=int(0.7 * vmem_cap))

    def wspec(shape, index_map):
        # Grid-invariant weights/biases: single-buffer to halve their VMEM use.
        if single_buffer_weights:
            return pl.BlockSpec(shape, index_map, pipeline_mode=pl.Buffered(1))
        return pl.BlockSpec(shape, index_map)

    flops = 2 * N * HW * C * (C + 2 * inter)
    transc = N * HW * C
    out_struct = jax.ShapeDtypeStruct((N, C, HW), jnp.float32)
    # NOTE: output stays f32 (module semantics); on v5e a bf16 output would
    # save ~25% of kernel wall time if the consumer tolerates it.

    if T == HW:
        # Whole image fits one lane-dense tile: fused single pass (reads x once).
        zero2 = lambda n: (0, 0)
        out = pl.pallas_call(
            _aff_fused_kernel,
            out_shape=out_struct,
            grid=(N,),
            in_specs=[pl.BlockSpec((1, C, HW), lambda n: (n, 0, 0)),
                      wspec(wr.shape, zero2), wspec(br.shape, zero2),
                      wspec(wl1.shape, zero2), wspec(bl1.shape, zero2),
                      wspec(wl2.shape, zero2), wspec(bl2.shape, zero2),
                      wspec(wg1.shape, zero2), wspec(bg1.shape, zero2),
                      wspec(wg2.shape, zero2), wspec(bg2.shape, zero2)],
            out_specs=pl.BlockSpec((1, C, HW), lambda n: (n, 0, 0)),
            compiler_params=cparams(("parallel",)),
            cost_estimate=pl.CostEstimate(flops=int(flops),
                                          transcendentals=int(transc),
                                          bytes_accessed=int(2 * x.size * 4)),
        )(x, wr, br, wl1, bl1, wl2, bl2, wg1, bg1, wg2, bg2)
    else:
        n_t = HW // T
        zero2 = lambda n, t: (0, 0)

        # Pass 1: per-image mean(xa) (recompute resid) + global-attention MLP.
        xg = pl.pallas_call(
            functools.partial(_aff_xg_kernel, inv_hw=1.0 / HW),
            out_shape=jax.ShapeDtypeStruct((N, C, XG_LANES), jnp.float32),
            grid=(N, n_t),
            in_specs=[pl.BlockSpec((1, C, T), lambda n, t: (n, 0, t)),
                      wspec(wr.shape, zero2), wspec(br.shape, zero2),
                      wspec(wg1.shape, zero2), wspec(bg1.shape, zero2),
                      wspec(wg2.shape, zero2), wspec(bg2.shape, zero2)],
            out_specs=pl.BlockSpec((1, C, XG_LANES), lambda n, t: (n, 0, 0)),
            scratch_shapes=[pltpu.VMEM((C, 1), jnp.float32)],
            compiler_params=cparams(("parallel", "arbitrary")),
            cost_estimate=pl.CostEstimate(flops=int(2 * N * HW * C * C),
                                          transcendentals=0,
                                          bytes_accessed=int(x.size * 4)),
        )(x, wr, br, wg1, bg1, wg2, bg2)

        # Pass 2: residual + local attention + fuse, fully parallel tiles.
        out = pl.pallas_call(
            _aff_main_kernel,
            out_shape=out_struct,
            grid=(N, n_t),
            in_specs=[pl.BlockSpec((1, C, T), lambda n, t: (n, 0, t)),
                      pl.BlockSpec((1, C, XG_LANES), lambda n, t: (n, 0, 0)),
                      wspec(wr.shape, zero2), wspec(br.shape, zero2),
                      wspec(wl1.shape, zero2), wspec(bl1.shape, zero2),
                      wspec(wl2.shape, zero2), wspec(bl2.shape, zero2)],
            out_specs=pl.BlockSpec((1, C, T), lambda n, t: (n, 0, t)),
            compiler_params=cparams(("parallel", "parallel")),
            cost_estimate=pl.CostEstimate(flops=int(flops),
                                          transcendentals=int(transc),
                                          bytes_accessed=int(2 * x.size * 4)),
        )(x, xg, wr, br, wl1, bl1, wl2, bl2)

    return out.reshape(N, C, H, W)


def aff_forward(x_nchw, params):
    try:
        return _aff_forward_impl(x_nchw, params, single_buffer_weights=True)
    except Exception:
        # pipeline_mode=pl.Buffered(1) not supported on this jax version:
        # fall back to default double buffering of the invariant weights.
        return _aff_forward_impl(x_nchw, params, single_buffer_weights=False)


# ------------------------- parameter construction ----------------------------
def make_folded_conv_bn(key, cin, cout):
    """1x1 Conv2d(cin->cout) + eval-mode BatchNorm2d folded into one
    (cin, cout) weight and (1, cout) bias."""
    k1, k2, k3, k4, k5, k6 = jax.random.split(key, 6)
    w = jax.random.normal(k1, (cin, cout), jnp.float32) / jnp.sqrt(cin)
    b = 0.1 * jax.random.normal(k2, (cout,), jnp.float32)
    gamma = 1.0 + 0.1 * jax.random.normal(k3, (cout,), jnp.float32)
    beta = 0.1 * jax.random.normal(k4, (cout,), jnp.float32)
    mean = 0.1 * jax.random.normal(k5, (cout,), jnp.float32)
    var = jnp.abs(jax.random.normal(k6, (cout,), jnp.float32)) + 0.5
    scale = gamma / jnp.sqrt(var + 1e-5)
    return w * scale[None, :], (scale * (b - mean) + beta).reshape(1, cout)


def prepare_kernel_params(base_params):
    """Transpose folded (cin,cout) weights to (cout,cin) for the
    channels-on-sublanes left-multiply layout and pick MXU dtypes:
    residual branch stays f32 (main data path), attention branches bf16;
    biases become (cout,1) f32 columns (lane-broadcast in-kernel)."""
    wr, br, wl1, bl1, wl2, bl2, wg1, bg1, wg2, bg2 = base_params
    t = lambda w, dt: jnp.asarray(w.T, dt)
    col = lambda b: jnp.asarray(b.reshape(-1, 1), jnp.float32)
    return (t(wr, jnp.float32), col(br),
            t(wl1, jnp.bfloat16), col(bl1),
            t(wl2, jnp.bfloat16), col(bl2),
            t(wg1, jnp.bfloat16), col(bg1),
            t(wg2, jnp.bfloat16), col(bg2))


# --------------------------- pure-JAX reference -------------------------------
def aff_ref(x_nchw, base_params):
    wr, br, wl1, bl1, wl2, bl2, wg1, bg1, wg2, bg2 = base_params
    N, C, H, W = x_nchw.shape
    x = jnp.transpose(x_nchw, (0, 2, 3, 1)).reshape(N, H * W, C)
    resid = jnp.maximum(jnp.einsum('nrc,cd->nrd', x, wr) + br + x, 0.0)
    xa = x + resid
    h = jnp.maximum(jnp.einsum('nrc,cd->nrd', xa, wl1) + bl1, 0.0)
    xl = jnp.einsum('nrc,cd->nrd', h, wl2) + bl2
    xam = jnp.mean(xa, axis=1, keepdims=True)
    hg = jnp.maximum(jnp.einsum('nrc,cd->nrd', xam, wg1) + bg1, 0.0)
    xg = jnp.einsum('nrc,cd->nrd', hg, wg2) + bg2
    wei = jax.nn.sigmoid(xl + xg)
    out = x * wei + xa * (1.0 - wei)
    return jnp.transpose(out.reshape(N, H, W, C), (0, 3, 1, 2))


# --------------------------------- main ---------------------------------------
if __name__ == "__main__":
    channels, r = 64, 4
    inter = channels // r                      # 16

    key = jax.random.PRNGKey(0)
    kx1, kx2, kr, kl1, kl2, kg1, kg2 = jax.random.split(key, 7)

    base = (
        *make_folded_conv_bn(kr,  channels, channels),   # ResidualConnection conv+BN
        *make_folded_conv_bn(kl1, channels, inter),      # local_att conv1+BN1
        *make_folded_conv_bn(kl2, inter, channels),      # local_att conv2+BN2
        *make_folded_conv_bn(kg1, channels, inter),      # global_att conv1+BN1
        *make_folded_conv_bn(kg2, inter, channels),      # global_att conv2+BN2
    )
    kparams = prepare_kernel_params(base)

    # Config A: H*W multiple of 128 -> tiled two-pass path (two-phase mean).
    x_a = jax.random.normal(kx1, (2, channels, 16, 16), jnp.float32)
    out_a = jax.block_until_ready(aff_forward(x_a, kparams))
    ref_a = aff_ref(x_a, base)
    np.testing.assert_allclose(np.asarray(out_a), np.asarray(ref_a),
                               rtol=2e-2, atol=2e-2)

    # Config B: small H*W -> fused single-pass path (whole image per block).
    x_b = jax.random.normal(kx2, (2, channels, 8, 8), jnp.float32)
    out_b = jax.block_until_ready(aff_forward(x_b, kparams))
    ref_b = aff_ref(x_b, base)
    np.testing.assert_allclose(np.asarray(out_b), np.asarray(ref_b),
                               rtol=2e-2, atol=2e-2)

    print("KERNEL_OK")
</pallas_src>

<mosaic_0001>
module attributes {stable_mosaic.version = 11 : i64} {
  func.func @_aff_xg_kernel(%arg0: i32, %arg1: i32, %arg2: memref<1x64x128xf32, #tpu.memory_space<vmem>>, %arg3: memref<64x64xf32, #tpu.memory_space<vmem>>, %arg4: memref<64x1xf32, #tpu.memory_space<vmem>>, %arg5: memref<16x64xbf16, #tpu.memory_space<vmem>>, %arg6: memref<16x1xf32, #tpu.memory_space<vmem>>, %arg7: memref<64x16xbf16, #tpu.memory_space<vmem>>, %arg8: memref<64x1xf32, #tpu.memory_space<vmem>>, %arg9: memref<1x64x128xf32, #tpu.memory_space<vmem>>, %arg10: memref<64x1xf32, #tpu.memory_space<vmem>>) attributes {dimension_semantics = [#tpu.dimension_semantics<parallel>, #tpu.dimension_semantics<arbitrary>], iteration_bounds = array<i64: 2, 2>, scalar_prefetch = 0 : i64, scratch_operands = 1 : i64, tpu.core_type = #tpu.core_type<tc>, window_params = [{transform_indices = @transform_0, window_bounds = array<i64: 1, 64, 128>}, {pipeline_mode = #tpu.pipeline_mode<synchronous>, transform_indices = @transform_1, window_bounds = array<i64: 64, 64>}, {pipeline_mode = #tpu.pipeline_mode<synchronous>, transform_indices = @transform_2, window_bounds = array<i64: 64, 1>}, {pipeline_mode = #tpu.pipeline_mode<synchronous>, transform_indices = @transform_3, window_bounds = array<i64: 16, 64>}, {pipeline_mode = #tpu.pipeline_mode<synchronous>, transform_indices = @transform_4, window_bounds = array<i64: 16, 1>}, {pipeline_mode = #tpu.pipeline_mode<synchronous>, transform_indices = @transform_5, window_bounds = array<i64: 64, 16>}, {pipeline_mode = #tpu.pipeline_mode<synchronous>, transform_indices = @transform_6, window_bounds = array<i64: 64, 1>}, {transform_indices = @transform_7, window_bounds = array<i64: 1, 64, 128>}]} {
    %c0_i32 = arith.constant 0 : i32
    %0 = arith.cmpi eq, %arg1, %c0_i32 : i32
    %1 = arith.extui %0 : i1 to i32
    %c0_i32_0 = arith.constant 0 : i32
    %2 = arith.cmpi ne, %1, %c0_i32_0 : i32
    scf.if %2 {
      %cst_14 = arith.constant 0.000000e+00 : f32
      %22 = vector.broadcast %cst_14 : f32 to vector<64x1xf32>
      %c0_15 = arith.constant 0 : index
      %c0_16 = arith.constant 0 : index
      %23 = vector.load %arg10[%c0_15, %c0_16] : memref<64x1xf32, #tpu.memory_space<vmem>>, vector<64x1xf32>
      tpu.vector_store %arg10[%c0_15, %c0_16], %22 {strides = array<i32>} : memref<64x1xf32, #tpu.memory_space<vmem>>, vector<64x1xf32>,
    } else {
    }
    %c0 = arith.constant 0 : index
    %c0_1 = arith.constant 0 : index
    %c0_2 = arith.constant 0 : index
    %3 = vector.load %arg2[%c0, %c0_1, %c0_2] : memref<1x64x128xf32, #tpu.memory_space<vmem>>, vector<1x64x128xf32>
    %4 = vector.shape_cast %3 : vector<1x64x128xf32> to vector<64x128xf32>
    %c0_3 = arith.constant 0 : index
    %c0_4 = arith.constant 0 : index
    %5 = vector.load %arg3[%c0_3, %c0_4] : memref<64x64xf32, #tpu.memory_space<vmem>>, vector<64x64xf32>
    %c0_5 = arith.constant 0 : index
    %c0_6 = arith.constant 0 : index
    %6 = vector.load %arg4[%c0_5, %c0_6] : memref<64x1xf32, #tpu.memory_space<vmem>>, vector<64x1xf32>
    %cst = arith.constant dense<0.000000e+00> : vector<64x128xf32>
    %7 = tpu.matmul %5, %4, %cst {dimension_numbers = #tpu.dot_dimension_numbers<[1], [0], [0], [1], [0, 0, 1, 1], [], []>} : vector<64x64xf32>, vector<64x128xf32>, vector<64x128xf32> -> vector<64x128xf32>
    %8 = vector.broadcast %6 : vector<64x1xf32> to vector<64x128xf32>
    %9 = arith.addf %7, %8 : vector<64x128xf32>
    %10 = arith.addf %9, %4 : vector<64x128xf32>
    %cst_7 = arith.constant 0.000000e+00 : f32
    %11 = vector.broadcast %cst_7 : f32 to vector<64x128xf32>
    %12 = arith.maximumf %10, %11 : vector<64x128xf32>
    %13 = arith.addf %4, %12 : vector<64x128xf32>
    %c0_8 = arith.constant 0 : index
    %c0_9 = arith.constant 0 : index
    %14 = vector.load %arg10[%c0_8, %c0_9] : memref<64x1xf32, #tpu.memory_space<vmem>>, vector<64x1xf32>
    %cst_10 = arith.constant dense<0.000000e+00> : vector<64xf32>
    %15 = vector.multi_reduction <add>, %13, %cst_10 [1] : vector<64x128xf32> to vector<64xf32>
    %16 = vector.shape_cast %15 : vector<64xf32> to vector<64x1xf32>
    %17 = arith.addf %14, %16 : vector<64x1xf32>
    %c0_11 = arith.constant 0 : index
    %c0_12 = arith.constant 0 : index
    %18 = vector.load %arg10[%c0_11, %c0_12] : memref<64x1xf32, #tpu.memory_space<vmem>>, vector<64x1xf32>
    tpu.vector_store %arg10[%c0_11, %c0_12], %17 {strides = array<i32>} : memref<64x1xf32, #tpu.memory_space<vmem>>, vector<64x1xf32>,
    %c1_i32 = arith.constant 1 : i32
    %19 = arith.cmpi eq, %arg1, %c1_i32 : i32
    %20 = arith.extui %19 : i1 to i32
    %c0_i32_13 = arith.constant 0 : i32
    %21 = arith.cmpi ne, %20, %c0_i32_13 : i32
    scf.if %21 {
      %c0_14 = arith.constant 0 : index
      %c0_15 = arith.constant 0 : index
      %22 = vector.load %arg10[%c0_14, %c0_15] : memref<64x1xf32, #tpu.memory_space<vmem>>, vector<64x1xf32>
      %cst_16 = arith.constant 3.906250e-03 : f32
      %23 = vector.broadcast %cst_16 : f32 to vector<64x1xf32>
      %24 = arith.mulf %22, %23 : vector<64x1xf32>
      %25 = vector.shape_cast %24 : vector<64x1xf32> to vector<64x1xf32>
      %26 = vector.broadcast %25 : vector<64x1xf32> to vector<64x128xf32>
      %c0_17 = arith.constant 0 : index
      %c0_18 = arith.constant 0 : index
      %27 = vector.load %arg5[%c0_17, %c0_18] : memref<16x64xbf16, #tpu.memory_space<vmem>>, vector<16x64xbf16>
      %c0_19 = arith.constant 0 : index
      %c0_20 = arith.constant 0 : index
      %28 = vector.load %arg6[%c0_19, %c0_20] : memref<16x1xf32, #tpu.memory_space<vmem>>, vector<16x1xf32>
      %c0_21 = arith.constant 0 : index
      %c0_22 = arith.constant 0 : index
      %29 = vector.load %arg7[%c0_21, %c0_22] : memref<64x16xbf16, #tpu.memory_space<vmem>>, vector<64x16xbf16>
      %c0_23 = arith.constant 0 : index
      %c0_24 = arith.constant 0 : index
      %30 = vector.load %arg8[%c0_23, %c0_24] : memref<64x1xf32, #tpu.memory_space<vmem>>, vector<64x1xf32>
      %31 = arith.truncf %26 : vector<64x128xf32> to vector<64x128xbf16>
      %cst_25 = arith.constant dense<0.000000e+00> : vector<16x128xf32>
      %32 = tpu.matmul %27, %31, %cst_25 {dimension_numbers = #tpu.dot_dimension_numbers<[1], [0], [0], [1], [0, 0, 1, 1], [], []>} : vector<16x64xbf16>, vector<64x128xbf16>, vector<16x128xf32> -> vector<16x128xf32>
      %33 = vector.broadcast %28 : vector<16x1xf32> to vector<16x128xf32>
      %34 = arith.addf %32, %33 : vector<16x128xf32>
      %cst_26 = arith.constant 0.000000e+00 : f32
      %35 = vector.broadcast %cst_26 : f32 to vector<16x128xf32>
      %36 = arith.maximumf %34, %35 : vector<16x128xf32>
      %37 = arith.truncf %36 : vector<16x128xf32> to vector<16x128xbf16>
      %cst_27 = arith.constant dense<0.000000e+00> : vector<64x128xf32>
      %38 = tpu.matmul %29, %37, %cst_27 {dimension_numbers = #tpu.dot_dimension_numbers<[1], [0], [0], [1], [0, 0, 1, 1], [], []>} : vector<64x16xbf16>, vector<16x128xbf16>, vector<64x128xf32> -> vector<64x128xf32>
      %39 = vector.broadcast %30 : vector<64x1xf32> to vector<64x128xf32>
      %40 = arith.addf %38, %39 : vector<64x128xf32>
      %c0_28 = arith.constant 0 : index
      %c0_29 = arith.constant 0 : index
      %c0_30 = arith.constant 0 : index
      %41 = vector.load %arg9[%c0_28, %c0_29, %c0_30] : memref<1x64x128xf32, #tpu.memory_space<vmem>>, vector<1x64x128xf32>
      %42 = vector.shape_cast %41 : vector<1x64x128xf32> to vector<64x128xf32>
      %43 = vector.shape_cast %40 : vector<64x128xf32> to vector<1x64x128xf32>
      tpu.vector_store %arg9[%c0_28, %c0_29, %c0_30], %43 {strides = array<i32>} : memref<1x64x128xf32, #tpu.memory_space<vmem>>, vector<1x64x128xf32>,
    } else {
    }
    return
  }
  func.func @transform_0(%arg0: i32, %arg1: i32) -> (i32, i32, i32) {
    %c0_i32 = arith.constant 0 : i32
    %c0_i32_0 = arith.constant 0 : i32
    return %arg0, %c0_i32, %arg1 : i32, i32, i32
  }
  func.func @transform_1(%arg0: i32, %arg1: i32) -> (i32, i32) {
    %c0_i32 = arith.constant 0 : i32
    %c0_i32_0 = arith.constant 0 : i32
    %c0_i32_1 = arith.constant 0 : i32
    return %c0_i32, %c0_i32_0 : i32, i32
  }
  func.func @transform_2(%arg0: i32, %arg1: i32) -> (i32, i32) {
    %c0_i32 = arith.constant 0 : i32
    %c0_i32_0 = arith.constant 0 : i32
    %c0_i32_1 = arith.constant 0 : i32
    return %c0_i32, %c0_i32_0 : i32, i32
  }
  func.func @transform_3(%arg0: i32, %arg1: i32) -> (i32, i32) {
    %c0_i32 = arith.constant 0 : i32
    %c0_i32_0 = arith.constant 0 : i32
    %c0_i32_1 = arith.constant 0 : i32
    return %c0_i32, %c0_i32_0 : i32, i32
  }
  func.func @transform_4(%arg0: i32, %arg1: i32) -> (i32, i32) {
    %c0_i32 = arith.constant 0 : i32
    %c0_i32_0 = arith.constant 0 : i32
    %c0_i32_1 = arith.constant 0 : i32
    return %c0_i32, %c0_i32_0 : i32, i32
  }
  func.func @transform_5(%arg0: i32, %arg1: i32) -> (i32, i32) {
    %c0_i32 = arith.constant 0 : i32
    %c0_i32_0 = arith.constant 0 : i32
    %c0_i32_1 = arith.constant 0 : i32
    return %c0_i32, %c0_i32_0 : i32, i32
  }
  func.func @transform_6(%arg0: i32, %arg1: i32) -> (i32, i32) {
    %c0_i32 = arith.constant 0 : i32
    %c0_i32_0 = arith.constant 0 : i32
    %c0_i32_1 = arith.constant 0 : i32
    return %c0_i32, %c0_i32_0 : i32, i32
  }
  func.func @transform_7(%arg0: i32, %arg1: i32) -> (i32, i32, i32) {
    %c0_i32 = arith.constant 0 : i32
    %c0_i32_0 = arith.constant 0 : i32
    %c0_i32_1 = arith.constant 0 : i32
    return %arg0, %c0_i32, %c0_i32_0 : i32, i32, i32
  }
}

module attributes {stable_mosaic.version = 11 : i64} {
  func.func @_aff_xg_kernel(%arg0: i32, %arg1: i32, %arg2: memref<1x64x128xf32, #tpu.memory_space<vmem>>, %arg3: memref<64x64xf32, #tpu.memory_space<vmem>>, %arg4: memref<64x1xf32, #tpu.memory_space<vmem>>, %arg5: memref<16x64xbf16, #tpu.memory_space<vmem>>, %arg6: memref<16x1xf32, #tpu.memory_space<vmem>>, %arg7: memref<64x16xbf16, #tpu.memory_space<vmem>>, %arg8: memref<64x1xf32, #tpu.memory_space<vmem>>, %arg9: memref<1x64x128xf32, #tpu.memory_space<vmem>>, %arg10: memref<64x1xf32, #tpu.memory_space<vmem>>) attributes {dimension_semantics = [#tpu.dimension_semantics<parallel>, #tpu.dimension_semantics<arbitrary>], iteration_bounds = array<i64: 2, 2>, scalar_prefetch = 0 : i64, scratch_operands = 1 : i64, tpu.core_type = #tpu.core_type<tc>, window_params = [{transform_indices = @transform_0, window_bounds = array<i64: 1, 64, 128>}, {pipeline_mode = #tpu.pipeline_mode<synchronous>, transform_indices = @transform_1, window_bounds = array<i64: 64, 64>}, {pipeline_mode = #tpu.pipeline_mode<synchronous>, transform_indices = @transform_2, window_bounds = array<i64: 64, 1>}, {pipeline_mode = #tpu.pipeline_mode<synchronous>, transform_indices = @transform_3, window_bounds = array<i64: 16, 64>}, {pipeline_mode = #tpu.pipeline_mode<synchronous>, transform_indices = @transform_4, window_bounds = array<i64: 16, 1>}, {pipeline_mode = #tpu.pipeline_mode<synchronous>, transform_indices = @transform_5, window_bounds = array<i64: 64, 16>}, {pipeline_mode = #tpu.pipeline_mode<synchronous>, transform_indices = @transform_6, window_bounds = array<i64: 64, 1>}, {transform_indices = @transform_7, window_bounds = array<i64: 1, 64, 128>}]} {
    %c0_i32 = arith.constant 0 : i32
    %0 = arith.cmpi eq, %arg1, %c0_i32 : i32
    %1 = arith.extui %0 : i1 to i32
    %c0_i32_0 = arith.constant 0 : i32
    %2 = arith.cmpi ne, %1, %c0_i32_0 : i32
    scf.if %2 {
      %cst_14 = arith.constant 0.000000e+00 : f32
      %22 = vector.broadcast %cst_14 : f32 to vector<64x1xf32>
      %c0_15 = arith.constant 0 : index
      %c0_16 = arith.constant 0 : index
      %23 = vector.load %arg10[%c0_15, %c0_16] : memref<64x1xf32, #tpu.memory_space<vmem>>, vector<64x1xf32>
      tpu.vector_store %arg10[%c0_15, %c0_16], %22 {strides = array<i32>} : memref<64x1xf32, #tpu.memory_space<vmem>>, vector<64x1xf32>,
    } else {
    }
    %c0 = arith.constant 0 : index
    %c0_1 = arith.constant 0 : index
    %c0_2 = arith.constant 0 : index
    %3 = vector.load %arg2[%c0, %c0_1, %c0_2] : memref<1x64x128xf32, #tpu.memory_space<vmem>>, vector<1x64x128xf32>
    %4 = vector.shape_cast %3 : vector<1x64x128xf32> to vector<64x128xf32>
    %c0_3 = arith.constant 0 : index
    %c0_4 = arith.constant 0 : index
    %5 = vector.load %arg3[%c0_3, %c0_4] : memref<64x64xf32, #tpu.memory_space<vmem>>, vector<64x64xf32>
    %c0_5 = arith.constant 0 : index
    %c0_6 = arith.constant 0 : index
    %6 = vector.load %arg4[%c0_5, %c0_6] : memref<64x1xf32, #tpu.memory_space<vmem>>, vector<64x1xf32>
    %cst = arith.constant dense<0.000000e+00> : vector<64x128xf32>
    %7 = tpu.matmul %5, %4, %cst {dimension_numbers = #tpu.dot_dimension_numbers<[1], [0], [0], [1], [0, 0, 1, 1], [], []>} : vector<64x64xf32>, vector<64x128xf32>, vector<64x128xf32> -> vector<64x128xf32>
    %8 = vector.broadcast %6 : vector<64x1xf32> to vector<64x128xf32>
    %9 = arith.addf %7, %8 : vector<64x128xf32>
    %10 = arith.addf %9, %4 : vector<64x128xf32>
    %cst_7 = arith.constant 0.000000e+00 : f32
    %11 = vector.broadcast %cst_7 : f32 to vector<64x128xf32>
    %12 = arith.maximumf %10, %11 : vector<64x128xf32>
    %13 = arith.addf %4, %12 : vector<64x128xf32>
    %c0_8 = arith.constant 0 : index
    %c0_9 = arith.constant 0 : index
    %14 = vector.load %arg10[%c0_8, %c0_9] : memref<64x1xf32, #tpu.memory_space<vmem>>, vector<64x1xf32>
    %cst_10 = arith.constant dense<0.000000e+00> : vector<64xf32>
    %15 = vector.multi_reduction <add>, %13, %cst_10 [1] : vector<64x128xf32> to vector<64xf32>
    %16 = vector.shape_cast %15 : vector<64xf32> to vector<64x1xf32>
    %17 = arith.addf %14, %16 : vector<64x1xf32>
    %c0_11 = arith.constant 0 : index
    %c0_12 = arith.constant 0 : index
    %18 = vector.load %arg10[%c0_11, %c0_12] : memref<64x1xf32, #tpu.memory_space<vmem>>, vector<64x1xf32>
    tpu.vector_store %arg10[%c0_11, %c0_12], %17 {strides = array<i32>} : memref<64x1xf32, #tpu.memory_space<vmem>>, vector<64x1xf32>,
    %c1_i32 = arith.constant 1 : i32
    %19 = arith.cmpi eq, %arg1, %c1_i32 : i32
    %20 = arith.extui %19 : i1 to i32
    %c0_i32_13 = arith.constant 0 : i32
    %21 = arith.cmpi ne, %20, %c0_i32_13 : i32
    scf.if %21 {
      %c0_14 = arith.constant 0 : index
      %c0_15 = arith.constant 0 : index
      %22 = vector.load %arg10[%c0_14, %c0_15] : memref<64x1xf32, #tpu.memory_space<vmem>>, vector<64x1xf32>
      %cst_16 = arith.constant 3.906250e-03 : f32
      %23 = vector.broadcast %cst_16 : f32 to vector<64x1xf32>
      %24 = arith.mulf %22, %23 : vector<64x1xf32>
      %25 = vector.shape_cast %24 : vector<64x1xf32> to vector<64x1xf32>
      %26 = vector.broadcast %25 : vector<64x1xf32> to vector<64x128xf32>
      %c0_17 = arith.constant 0 : index
      %c0_18 = arith.constant 0 : index
      %27 = vector.load %arg5[%c0_17, %c0_18] : memref<16x64xbf16, #tpu.memory_space<vmem>>, vector<16x64xbf16>
      %c0_19 = arith.constant 0 : index
      %c0_20 = arith.constant 0 : index
      %28 = vector.load %arg6[%c0_19, %c0_20] : memref<16x1xf32, #tpu.memory_space<vmem>>, vector<16x1xf32>
      %c0_21 = arith.constant 0 : index
      %c0_22 = arith.constant 0 : index
      %29 = vector.load %arg7[%c0_21, %c0_22] : memref<64x16xbf16, #tpu.memory_space<vmem>>, vector<64x16xbf16>
      %c0_23 = arith.constant 0 : index
      %c0_24 = arith.constant 0 : index
      %30 = vector.load %arg8[%c0_23, %c0_24] : memref<64x1xf32, #tpu.memory_space<vmem>>, vector<64x1xf32>
      %31 = arith.truncf %26 : vector<64x128xf32> to vector<64x128xbf16>
      %cst_25 = arith.constant dense<0.000000e+00> : vector<16x128xf32>
      %32 = tpu.matmul %27, %31, %cst_25 {dimension_numbers = #tpu.dot_dimension_numbers<[1], [0], [0], [1], [0, 0, 1, 1], [], []>} : vector<16x64xbf16>, vector<64x128xbf16>, vector<16x128xf32> -> vector<16x128xf32>
      %33 = vector.broadcast %28 : vector<16x1xf32> to vector<16x128xf32>
      %34 = arith.addf %32, %33 : vector<16x128xf32>
      %cst_26 = arith.constant 0.000000e+00 : f32
      %35 = vector.broadcast %cst_26 : f32 to vector<16x128xf32>
      %36 = arith.maximumf %34, %35 : vector<16x128xf32>
      %37 = arith.truncf %36 : vector<16x128xf32> to vector<16x128xbf16>
      %cst_27 = arith.constant dense<0.000000e+00> : vector<64x128xf32>
      %38 = tpu.matmul %29, %37, %cst_27 {dimension_numbers = #tpu.dot_dimension_numbers<[1], [0], [0], [1], [0, 0, 1, 1], [], []>} : vector<64x16xbf16>, vector<16x128xbf16>, vector<64x128xf32> -> vector<64x128xf32>
      %39 = vector.broadcast %30 : vector<64x1xf32> to vector<64x128xf32>
      %40 = arith.addf %38, %39 : vector<64x128xf32>
      %c0_28 = arith.constant 0 : index
      %c0_29 = arith.constant 0 : index
      %c0_30 = arith.constant 0 : index
      %41 = vector.load %arg9[%c0_28, %c0_29, %c0_30] : memref<1x64x128xf32, #tpu.memory_space<vmem>>, vector<1x64x128xf32>
      %42 = vector.shape_cast %41 : vector<1x64x128xf32> to vector<64x128xf32>
      %43 = vector.shape_cast %40 : vector<64x128xf32> to vector<1x64x128xf32>
      tpu.vector_store %arg9[%c0_28, %c0_29, %c0_30], %43 {strides = array<i32>} : memref<1x64x128xf32, #tpu.memory_space<vmem>>, vector<1x64x128xf32>,
    } else {
    }
    return
  }
  func.func @transform_0(%arg0: i32, %arg1: i32) -> (i32, i32, i32) {
    %c0_i32 = arith.constant 0 : i32
    %c0_i32_0 = arith.constant 0 : i32
    return %arg0, %c0_i32, %arg1 : i32, i32, i32
  }
  func.func @transform_1(%arg0: i32, %arg1: i32) -> (i32, i32) {
    %c0_i32 = arith.constant 0 : i32
    %c0_i32_0 = arith.constant 0 : i32
    %c0_i32_1 = arith.constant 0 : i32
    return %c0_i32, %c0_i32_0 : i32, i32
  }
  func.func @transform_2(%arg0: i32, %arg1: i32) -> (i32, i32) {
    %c0_i32 = arith.constant 0 : i32
    %c0_i32_0 = arith.constant 0 : i32
    %c0_i32_1 = arith.constant 0 : i32
    return %c0_i32, %c0_i32_0 : i32, i32
  }
  func.func @transform_3(%arg0: i32, %arg1: i32) -> (i32, i32) {
    %c0_i32 = arith.constant 0 : i32
    %c0_i32_0 = arith.constant 0 : i32
    %c0_i32_1 = arith.constant 0 : i32
    return %c0_i32, %c0_i32_0 : i32, i32
  }
  func.func @transform_4(%arg0: i32, %arg1: i32) -> (i32, i32) {
    %c0_i32 = arith.constant 0 : i32
    %c0_i32_0 = arith.constant 0 : i32
    %c0_i32_1 = arith.constant 0 : i32
    return %c0_i32, %c0_i32_0 : i32, i32
  }
  func.func @transform_5(%arg0: i32, %arg1: i32) -> (i32, i32) {
    %c0_i32 = arith.constant 0 : i32
    %c0_i32_0 = arith.constant 0 : i32
    %c0_i32_1 = arith.constant 0 : i32
    return %c0_i32, %c0_i32_0 : i32, i32
  }
  func.func @transform_6(%arg0: i32, %arg1: i32) -> (i32, i32) {
    %c0_i32 = arith.constant 0 : i32
    %c0_i32_0 = arith.constant 0 : i32
    %c0_i32_1 = arith.constant 0 : i32
    return %c0_i32, %c0_i32_0 : i32, i32
  }
  func.func @transform_7(%arg0: i32, %arg1: i32) -> (i32, i32, i32) {
    %c0_i32 = arith.constant 0 : i32
    %c0_i32_0 = arith.constant 0 : i32
    %c0_i32_1 = arith.constant 0 : i32
    return %arg0, %c0_i32, %c0_i32_0 : i32, i32, i32
  }
}

</mosaic_0001>

<bundles_post_ra>
// kernel: tpu_custom_call.1
= control target key start
LH: loop header
LB: loop body
LE: loop exit
PB: predicated region body
PF: predicated region fallthrough
CT: control target
= control target key end

     0   :  { %s1633_s0 = inlined_call_operand.hbm [shape: f32[2,64,256], index: 0, kind: input, shape index: {}]   ;;  %s1634_s1 = inlined_call_operand.vmem [shape: f32[64,64], index: 1, kind: input, shape index: {}]   ;;  %s1635_s2 = inlined_call_operand.vmem [shape: f32[64,1], index: 2, kind: input, shape index: {}]   ;;  %s1636_s3 = inlined_call_operand.vmem [shape: bf16[16,64], index: 3, kind: input, shape index: {}]   ;;  %s1637_s4 = inlined_call_operand.vmem [shape: f32[16,1], index: 4, kind: input, shape index: {}]   ;;  %s1638_s5 = inlined_call_operand.vmem [shape: bf16[64,16], index: 5, kind: input, shape index: {}]   ;;  %s1639_s6 = inlined_call_operand.vmem [shape: f32[64,1], index: 6, kind: input, shape index: {}]   ;;  %s1640_s7 = inlined_call_operand.hbm [shape: f32[2,64,128], index: 7, kind: output, shape index: {}]  }
   0x1   :  { %1649 = sst [smem:[#allocation18_spill]] %s1640_s7 }
   0x2   :  { %12 = vsyncpa [#allocation4], 0 }
   0x3   :  { %14 = vsyncpa [#allocation4 + $0x1], 0 }
   0x4   :  { %15 = vsyncpa [#allocation5], 0 }
   0x5   :  { %17 = vsyncpa [#allocation5 + $0x1], 0  ;;  %s1274_s24 = smov 0   ;;  %s1276_s25 = smov 0  }
   0x6   :  { %s1278_s26 = smov 0   ;;  %s1280_s27 = smov 0  }
   0x7   :  { %s1282_s28 = smov 0   ;;  %s1284_s29 = smov 0  }
   0x8   :  { %s1286_s30 = smov 0   ;;  %s1288_s8 = smov 0  }
   0x9   :  { %s1290_s9 = smov 0   ;;  %s1292_s10 = smov 0  }
   0xa   :  { %s1294_s11 = smov 0  }
   0xb LB: > { %1650 = sst [smem:[#allocation9_spill]] %s1192_s26  ;;  %s854_s12 = sadd.s32 4294967295, %s1224_s11   ;;  %s1224_s11 = sphi %s1294_s11, %s23_s11   ;;  %s1220_s10 = sphi %s1292_s10, %s1680_s10   ;;  %s1216_s9 = sphi %s1290_s9, %s1679_s9   ;;  %s1212_s8 = sphi %s1288_s8, %s1678_s8   ;;  %s1208_s30 = sphi %s1286_s30, %s1677_s30   ;;  %s1204_s29 = sphi %s1284_s29, %s1670_s29   ;;  %s1200_s28 = sphi %s1282_s28, %s1676_s28   ;;  %s1196_s27 = sphi %s1280_s27, %s1675_s27   ;;  %s1192_s26 = sphi %s1278_s26, %s1668_s26   ;;  %s1188_s25 = sphi %s1276_s25, %s1674_s25   ;;  %s1184_s24 = sphi %s1274_s24, %s1673_s24  }
   0xc   : > { %1651 = sst [smem:[#allocation10_spill]] %s1204_s29  ;;  %s855_s13 = sadd.s32 4294967294, %s1224_s11  }
   0xd   : > { %1652 = sst [smem:[#allocation11_spill]] %s1212_s8  ;;  %s32_s14 = sadd.s32 1, %s1216_s9 }
   0xe   : > { %s35_s15 = sadd.s32 1, %s1220_s10  ;;  %p33_p0 = scmp.ge.s32.totalorder %s32_s14, 2 }
   0xf   : > { %s44_s16 = sadd.s32 1, %s1204_s29  ;;  %p51_p1 = scmp.ne.s32.totalorder %s1204_s29, %s1200_s28 }
  0x10   : > { %p52_p2 = scmp.eq.s32.totalorder %s1224_s11, 0  ;;  %s1682_s14 = smov (%p33_p0, %s32_s14), 0 }
  0x11   : > { %1653 = sst [smem:[#allocation12_spill]] %s1682_s14  ;;  %s1684_s15 = smov (!%p33_p0, %s35_s15), %s1220_s10 }
  0x12   : > { %s40_s17 = ssub.s32 %s1216_s9, %s1682_s14  ;;  %p1340_p3 = por %p52_p2, %p51_p1 }
  0x13   : > { %p37_p4 = scmp.ge.s32.totalorder %s1684_s15, 2  ;;  %p57_p5 = scmp.ne.s32.totalorder %s1200_s28, %s1196_s27 }
  0x14   : > { %p58_p6 = scmp.eq.s32.totalorder %s854_s12, 0  ;;  %s196_s19 = sadd.s32 1, %s1192_s26 }
  0x15   : > { %s1686_s15 = smov (%p37_p4, %s1684_s15), 0  ;;  %p206_p8 = scmp.ne.s32.totalorder %s1192_s26, %s1188_s25 }
  0x16   : > { %1655 = sst [smem:[#allocation13_spill]] %s1686_s15  ;;  %p1348_p7 = por %p58_p6, %p57_p5 }
  0x17   : > { %s39_s21 = ssub.s32 %s1220_s10, %s1686_s15  ;;  %p207_p9 = scmp.eq.s32.totalorder %s854_s12, 3 }
  0x18   : > { %s41_s22 = sor.u32 %s40_s17, %s39_s21  ;;  %p194_p10 = scmp.eq.s32.totalorder %s39_s21, 0 }
  0x19   : > { %p42_p11 = scmp.eq.s32.totalorder %s41_s22, 0  ;;  %p1356_p12 = por %p207_p9, %p206_p8 }
  0x1a   : > { %s1361_s27 = scalar_select %p194_p10, %s1192_s26, %s196_s19  }
  0x1b   : > { %s1657_s23 = scalar_select %p1356_p12, 1, 0 }
  0x1c   : > { %1659 = sst [smem:[#allocation15_spill]] %s1361_s27  ;;  %p212_p13 = scmp.ne.s32.totalorder %s1188_s25, %s1184_s24 }
  0x1d   : > { %1658 = sst [smem:[#allocation14_spill]] %s1657_s23  ;;  %p213_p0 = scmp.eq.s32.totalorder %s855_s13, 3 }
  0x1e   : > { %s1364_s14 = scalar_select %p42_p11, %s1204_s29, %s44_s16  }
  0x1f   : > { %p948_p1 = scmp.lt.s32.totalorder %s1224_s11, 4  ;;  %p1369_p2 = por %p213_p0, %p212_p13 }
  0x20   : > { %1660 = sst [smem:[#allocation16_spill]] %s1364_s14  ;;  %s251_s12 = sand.u32 1, %s1204_s29  }
  0x21   : > { %s1661_s7 = scalar_select %p1369_p2, 1, 0 }
  0x22   : > { %s858_s17 = sshll.u32 %s251_s12, 6  ;;  %s859_s21 = sshll.u32 %s1220_s10, 4 }
  0x23   : > { %1662 = sst [smem:[#allocation17_spill]] %s1661_s7  ;;  %s259_s22 = sadd.s32 %s1216_s9, %s859_s21 }
  0x24   : > { %s255_s15 = scalar_lea.vmem [#allocation3], %s858_s17  ;;  %s860_s8 = sshll.u32 %s259_s22, 3 }
  0x25   : > { %s264_s23 = sshll.u32 %s255_s15, 4  ;;  %s261_s14 = scalar_lea.hbm %s1633_s0, %s860_s8  ;;  %s265_s23 = int_to_ptr.vmem [resolvable:$true] %s264_s23 }
  0x26   : > { %p941_p4 = pnand %p948_p1, %p1340_p3  ;;  %s262_s13 = sshll.u32 %s261_s14, 4  ;;  %s263_s13 = int_to_ptr.hbm [resolvable:$true] %s262_s13 }
  0x27   : > { %s252_s27 = scalar_lea.sflag [#allocation4], %s251_s12  ;;  %s1226_s26 = smov 256  }
  0x28   : > { %s1227_s29 = smov 128   ;;  %s1228_s7 = smov 8  }
  0x29   : > { %943 = dma.hbm_to_vmem [thread:$0]  (!%p941_p4), %s263_s13, 1024, %s265_s23, %s252_s27, %s1226_s26, %s1227_s29, %s1228_s7  }
  0x2a   : > { %p861_p5 = scmp.ge.s32.totalorder %s1224_s11, 1  ;;  %p272_p6 = scmp.lt.s32.totalorder %s1224_s11, 5 }
  0x2c   : > { %p273_p8 = pnand %p861_p5, %p272_p6 }
  0x2d   : > { %s278_s15 = sand.u32 (!%p273_p8), 1, %s1200_s28  }
  0x2e   : > { %276 = sbr.rel (%p273_p8) target bundleno = 836 (0x344), region = 48  ;;  %s862_s17 = sshll.u32 (!%p273_p8), %s278_s15, 6 }
  0x2f   : > { %s279_s21 = scalar_lea.sflag (!%p273_p8), [#allocation4], %s278_s15  ;;  %s1384_s22 = scalar_lea.vmem (!%p273_p8), [#allocation3], %s862_s17 }
  0x33   : > { %1175 = dma.done.wait (%p1348_p7), %s279_s21, 1024  }
  0x34   : > { %1177 = vsyncadd (%p1348_p7), %s279_s21, 4294966272  ;;  %s311_s8 = sand.u32 1, %s1188_s25   ;;  %p864_p3 = scmp.ne.s32.totalorder %s1208_s30, 0 }
  0x35   : > { %s863_s7 = sshll.u32 %s311_s8, 6 }
  0x36   : > { %s1393_s26 = scalar_lea.vmem [#allocation6], %s863_s7  ;;  %318 = sbr.rel (%p864_p3) target bundleno = 68 (0x44), region = 56 }
  0x3b   : > { %vm319_vm0 = vcmask 7168   ;;  %v1229_v0 = vmov 0.0  }
  0x3c   : > { %320 = vst.msk [vmem:[#allocation2] sm:$0xff] %vm319_vm0, %v1229_v0 }
  0x3d   : > { %321 = vst.msk [vmem:[#allocation2 + $0x8] sm:$0xff] %vm319_vm0, %v1229_v0 }
  0x3e   : > { %322 = vst.msk [vmem:[#allocation2 + $0x10] sm:$0xff] %vm319_vm0, %v1229_v0 }
  0x3f   : > { %323 = vst.msk [vmem:[#allocation2 + $0x18] sm:$0xff] %vm319_vm0, %v1229_v0 }
  0x40   : > { %324 = vst.msk [vmem:[#allocation2 + $0x20] sm:$0xff] %vm319_vm0, %v1229_v0 }
  0x41   : > { %325 = vst.msk [vmem:[#allocation2 + $0x28] sm:$0xff] %vm319_vm0, %v1229_v0 }
  0x42   : > { %326 = vst.msk [vmem:[#allocation2 + $0x30] sm:$0xff] %vm319_vm0, %v1229_v0 }
  0x43   : > { %327 = vst.msk [vmem:[#allocation2 + $0x38] sm:$0xff] %vm319_vm0, %v1229_v0 }
  0x44 PF: > { %v1397_v1 = vld [vmem:[%s1384_s22 + $0x38] sm:$0xff]  ;;  %v1400_v2 = vld [vmem:[%s1384_s22 + $0x30] sm:$0xff]  ;;  %v1407_v3 = vld [vmem:[%s1384_s22 + $0x28] sm:$0xff]  ;;  %v1230_v8 = vmov 0   ;;  %vm392_vm1 = vcmask 523264   ;;  %vm514_vm2 = vcmask 7168  }
  0x45   : > { %425 = vmatpush.msra.mxu0 %v1397_v1  ;;  %910 = vmatpush.msra.mxu1 %v1397_v1  ;;  %v1414_v4 = vld [vmem:[%s1384_s22 + $0x20] sm:$0xff]  ;;  %v1421_v5 = vld [vmem:[%s1384_s22 + $0x18] sm:$0xff]  ;;  %v1428_v6 = vld [vmem:[%s1384_s22 + $0x10] sm:$0xff]  ;;  %p873_p7 = scmp.ne.s32.totalorder %s1208_s30, 1 }
  0x46   : > { %911 = vmatpush.msra.mxu2 %v1397_v1  ;;  %912 = vmatpush.msra.mxu3 %v1397_v1  ;;  %v344_v7 = vld [vmem:[%s1635_s2] sm:$0xff]  ;;  %v1439_v9 = vld [vmem:[%s1384_s22 + $0x8] sm:$0xff]  ;;  %v338_v12 = vld [vmem:[%s1634_s1 + $0x10] sm:$0xff] }
  0x47   : > { %426 = vmatpush.msra.mxu0 %v1400_v2  ;;  %913 = vmatpush.msra.mxu1 %v1400_v2  ;;  %v328_v10 = vld [vmem:[%s1384_s22] sm:$0xff]  ;;  %v342_v14 = vld [vmem:[%s1634_s1 + $0x30] sm:$0xff]  ;;  %v345_v15 = vld [vmem:[%s1635_s2 + $0x8] sm:$0xff] }
  0x48   : > { %914 = vmatpush.msra.mxu2 %v1400_v2  ;;  %915 = vmatpush.msra.mxu3 %v1400_v2  ;;  %v336_v11 = vld [vmem:[%s1634_s1] sm:$0xff]  ;;  %v346_v16 = vld [vmem:[%s1635_s2 + $0x10] sm:$0xff]  ;;  %v337_v18 = vld [vmem:[%s1634_s1 + $0x8] sm:$0xff] }
  0x49   : > { %427 = vmatpush.msra.mxu0 %v1407_v3  ;;  %916 = vmatpush.msra.mxu1 %v1407_v3  ;;  %v340_v13 = vld [vmem:[%s1634_s1 + $0x20] sm:$0xff]  ;;  %v339_v19 = vld [vmem:[%s1634_s1 + $0x18] sm:$0xff]  ;;  %v341_v20 = vld [vmem:[%s1634_s1 + $0x28] sm:$0xff] }
  0x4a   : > { %917 = vmatpush.msra.mxu2 %v1407_v3  ;;  %918 = vmatpush.msra.mxu3 %v1407_v3  ;;  %v348_v17 = vld [vmem:[%s1635_s2 + $0x20] sm:$0xff]  ;;  %v343_v21 = vld [vmem:[%s1634_s1 + $0x38] sm:$0xff]  ;;  %v350_v22 = vld [vmem:[%s1635_s2 + $0x30] sm:$0xff] }
  0x4b   : > { %428 = vmatpush.msra.mxu0 %v1414_v4  ;;  %919 = vmatpush.msra.mxu1 %v1414_v4  ;;  %v347_v23 = vld [vmem:[%s1635_s2 + $0x18] sm:$0xff]  ;;  %v349_v24 = vld [vmem:[%s1635_s2 + $0x28] sm:$0xff] }
  0x4c   : > { %920 = vmatpush.msra.mxu2 %v1414_v4  ;;  %921 = vmatpush.msra.mxu3 %v1414_v4  ;;  %v351_v25 = vld [vmem:[%s1635_s2 + $0x38] sm:$0xff] }
  0x4d   : > { %429 = vmatpush.msra.mxu0 %v1421_v5  ;;  %922 = vmatpush.msra.mxu1 %v1421_v5 }
  0x4e   : > { %923 = vmatpush.msra.mxu2 %v1421_v5  ;;  %924 = vmatpush.msra.mxu3 %v1421_v5 }
  0x4f   : > { %1046 = vset.pattern.permute.xlu0 %v1230_v8  ;;  %430 = vmatpush.msra.mxu0 %v1428_v6 }
  0x50   : > { %354 = vperm.xlu0 %1046, %v344_v7   ;;  %925 = vmatpush.msra.mxu1 %v1428_v6 }
  0x51   : > { %926 = vmatpush.msra.mxu2 %v1428_v6  ;;  %927 = vmatpush.msra.mxu3 %v1428_v6 }
  0x52   : > { %431 = vmatpush.msra.mxu0 %v1439_v9  ;;  %928 = vmatpush.msra.mxu1 %v1439_v9 }
  0x53   : > { %929 = vmatpush.msra.mxu2 %v1439_v9  ;;  %930 = vmatpush.msra.mxu3 %v1439_v9 }
  0x54   : > { %432 = vmatpush.msra.mxu0 %v328_v10  ;;  %931 = vmatpush.msra.mxu1 %v328_v10 }
  0x55   : > { %932 = vmatpush.msra.mxu2 %v328_v10  ;;  %933 = vmatpush.msra.mxu3 %v328_v10 }
  0x56   : > { %865 = vmatmul.msk.f32.vlgmr.msra.gmra.mxu0 %vm392_vm1, %v336_v11  ;;  %867 = vmatmul.msk.f32.vlgmr.msra.gmra.mxu1 %vm392_vm1, %v338_v12 }
  0x57   : > { %869 = vmatmul.msk.f32.vlgmr.msra.gmra.mxu2 %vm392_vm1, %v340_v13  ;;  %871 = vmatmul.msk.f32.vlgmr.msra.gmra.mxu3 %vm392_vm1, %v342_v14  ;;  %v482_v13 = vld [vmem:[#allocation2] sm:$0xff]  ;;  %v484_v14 = vld [vmem:[#allocation2 + $0x10] sm:$0xff] }
  0x58   : > { %1047 = vset.pattern.permute.xlu1 %v1230_v8  ;;  %359 = vperm.xlu0 %1046, %v345_v15  }
  0x59   : > { %364 = vperm.xlu1 %1047, %v346_v16   ;;  %1048 = vset.pattern.permute.xlu2 %v1230_v8 }
  0x5a   : > { %374 = vperm.xlu2 %1048, %v348_v17  }
  0x5e   : > { %866 = vmatmul.msk.f32.gmra.mxu0 %vm392_vm1, %v337_v18  ;;  %868 = vmatmul.msk.f32.gmra.mxu1 %vm392_vm1, %v339_v19  ;;  %v486_v19 = vld [vmem:[#allocation2 + $0x20] sm:$0xff] }
  0x5f   : > { %870 = vmatmul.msk.f32.gmra.mxu2 %vm392_vm1, %v341_v20  ;;  %872 = vmatmul.msk.f32.gmra.mxu3 %vm392_vm1, %v343_v21 }
  0x60   : > { %384 = vperm.xlu0 %1046, %v350_v22  }
  0x61   : > { %369 = vperm.xlu1 %1047, %v347_v23  }
  0x62   : > { %379 = vperm.xlu2 %1048, %v349_v24  }
  0x69   : > { %389 = vperm.xlu1 %1047, %v351_v25   ;;  %v487_v25 = vld [vmem:[#allocation2 + $0x28] sm:$0xff] }
  0xb4   : > { %v375_v35 = vpop.permute.xlu2 %374 }
  0xbc   : > { %v380_v57 = vpop.permute.xlu2 %379 }
  0xc2   : > { %v355_v26 = vpop.permute.xlu0 %354 }
  0xca   : > { %v360_v27 = vpop.permute.xlu0 %359 }
  0xcb   : > { %v365_v28 = vpop.permute.xlu1 %364 }
  0xd2   : > { %v385_v37 = vpop.permute.xlu0 %384 }
  0xd3   : > { %v434_v29 = vpop.f32.mrf.mxu0  ;;  %v440_v31 = vpop.f32.mrf.mxu1 }
  0xd4   : > { %v435_v30 = vadd.f32 %v434_v29, %v355_v26  ;;  %v441_v32 = vadd.f32 %v440_v31, %v365_v28  ;;  %v370_v42 = vpop.permute.xlu1 %369  ;;  %v485_v26 = vld [vmem:[#allocation2 + $0x18] sm:$0xff] }
  0xd5   : > { %v489_v31 = vld [vmem:[#allocation2 + $0x38] sm:$0xff] }
  0xd6   : > { %v458_v33 = vadd.f32 %v435_v30, %v328_v10  ;;  %v460_v34 = vadd.f32 %v441_v32, %v1428_v6 }
  0xd8   : > { %v466_v36 = vmax.f32 %v458_v33, 0.0  ;;  %v468_v38 = vmax.f32 %v460_v34, 0.0 }
  0xda   : > { %v446_v39 = vpop.f32.mrf.mxu2  ;;  %v452_v40 = vpop.f32.mrf.mxu3  ;;  %v474_v41 = vadd.f32 %v466_v36, %v328_v10  ;;  %v476_v46 = vadd.f32 %v468_v38, %v1428_v6 }
  0xdb   : > { %v447_v43 = vadd.f32 %v446_v39, %v375_v35  ;;  %v453_v44 = vadd.f32 %v452_v40, %v385_v37  ;;  %v437_v45 = vpop.f32.mrf.mxu0  ;;  %v443_v48 = vpop.f32.mrf.mxu1 }
  0xdc   : > { %v438_v47 = vadd.f32 %v437_v45, %v360_v27  ;;  %490 = vadd.xlane.f32.xlu2 %v474_v41  ;;  %494 = vadd.xlane.f32.xlu1 %v476_v46  ;;  %v444_v52 = vadd.f32 %v443_v48, %v370_v42  ;;  %v390_v0 = vpop.permute.xlu1 %389 }
  0xdd   : > { %v462_v49 = vadd.f32 %v447_v43, %v1414_v4  ;;  %v464_v50 = vadd.f32 %v453_v44, %v1400_v2 }
  0xde   : > { %v459_v51 = vadd.f32 %v438_v47, %v1439_v9  ;;  %v461_v58 = vadd.f32 %v444_v52, %v1421_v5 }
  0xdf   : > { %v470_v53 = vmax.f32 %v462_v49, 0.0  ;;  %v472_v54 = vmax.f32 %v464_v50, 0.0 }
  0xe0   : > { %v467_v55 = vmax.f32 %v459_v51, 0.0  ;;  %v469_v7 = vmax.f32 %v461_v58, 0.0 }
  0xe1   : > { %v478_v56 = vadd.f32 %v470_v53, %v1414_v4  ;;  %v480_v63 = vadd.f32 %v472_v54, %v1400_v2 }
  0xe2   : > { %v449_v59 = vpop.f32.mrf.mxu2  ;;  %v475_v60 = vadd.f32 %v467_v55, %v1439_v9  ;;  %v455_v62 = vpop.f32.mrf.mxu3  ;;  %v477_v12 = vadd.f32 %v469_v7, %v1421_v5  ;;  %v488_v5 = vld [vmem:[#allocation2 + $0x30] sm:$0xff] }
  0xe3   : > { %v450_v61 = vadd.f32 %v449_v59, %v380_v57  ;;  %v456_v8 = vadd.f32 %v455_v62, %v390_v0 }
  0xe4   : > { %492 = vadd.xlane.f32.xlu0 %v475_v60  ;;  %498 = vadd.xlane.f32.xlu2 %v478_v56 }
  0xe5   : > { %v463_v6 = vadd.f32 %v450_v61, %v1407_v3  ;;  %502 = vadd.xlane.f32.xlu1 %v480_v63  ;;  %v465_v4 = vadd.f32 %v456_v8, %v1397_v1 }
  0xe7   : > { %v471_v10 = vmax.f32 %v463_v6, 0.0  ;;  %v473_v9 = vmax.f32 %v465_v4, 0.0 }
  0xe9   : > { %v479_v11 = vadd.f32 %v471_v10, %v1407_v3  ;;  %v481_v2 = vadd.f32 %v473_v9, %v1397_v1  ;;  %v483_v3 = vld [vmem:[#allocation2 + $0x8] sm:$0xff] }
  0xec   : > { %500 = vadd.xlane.f32.xlu0 %v479_v11  ;;  %496 = vadd.xlane.f32.xlu2 %v477_v12 }
  0xf4   : > { %504 = vadd.xlane.f32.xlu2 %v481_v2 }
 0x14f   : > { %v491_v15 = vpop.xlane.xlu2 %490  ;;  %v495_v16 = vpop.xlane.xlu1 %494 }
 0x150   : > { %v506_v17 = vadd.f32 %v491_v15, %v482_v13  ;;  %v508_v18 = vadd.f32 %v495_v16, %v484_v14 }
 0x152   : > { %515 = vst.msk [vmem:[#allocation2] sm:$0xff] %vm514_vm2, %v506_v17 }
 0x153   : > { %517 = vst.msk [vmem:[#allocation2 + $0x10] sm:$0xff] %vm514_vm2, %v508_v18 }
 0x157   : > { %v493_v20 = vpop.xlane.xlu0 %492  ;;  %v499_v21 = vpop.xlane.xlu2 %498 }
 0x158   : > { %v503_v22 = vpop.xlane.xlu1 %502  ;;  %v507_v23 = vadd.f32 %v493_v20, %v483_v3  ;;  %v510_v1 = vadd.f32 %v499_v21, %v486_v19 }
 0x159   : > { %v512_v24 = vadd.f32 %v503_v22, %v488_v5 }
 0x15a   : > { %516 = vst.msk [vmem:[#allocation2 + $0x8] sm:$0xff] %vm514_vm2, %v507_v23 }
 0x15b   : > { %521 = vst.msk [vmem:[#allocation2 + $0x30] sm:$0xff] %vm514_vm2, %v512_v24 }
 0x15c   : > { %519 = vst.msk [vmem:[#allocation2 + $0x20] sm:$0xff] %vm514_vm2, %v510_v1 }
 0x15f   : > { %v501_v27 = vpop.xlane.xlu0 %500  ;;  %v497_v28 = vpop.xlane.xlu2 %496 }
 0x160   : > { %v511_v29 = vadd.f32 %v501_v27, %v487_v25  ;;  %v509_v30 = vadd.f32 %v497_v28, %v485_v26 }
 0x162   : > { %520 = vst.msk [vmem:[#allocation2 + $0x28] sm:$0xff] %vm514_vm2, %v511_v29 }
 0x163   : > { %518 = vst.msk [vmem:[#allocation2 + $0x18] sm:$0xff] %vm514_vm2, %v509_v30 }
 0x166   : > { %526 = sbr.rel (%p873_p7) target bundleno = 814 (0x32e), region = 60 }
 0x167   : > { %v505_v32 = vpop.xlane.xlu2 %504 }
 0x168   : > { %v513_v33 = vadd.f32 %v505_v32, %v489_v31 }
 0x16a   : > { %522 = vst.msk [vmem:[#allocation2 + $0x38] sm:$0xff] %vm514_vm2, %v513_v33 }
 0x16b   : > { %v533_v34 = vld [vmem:[#allocation2 + $0x30] sm:$0xff]  ;;  %v1231_v37 = vmov 0   ;;  %v530_v40 = vld [vmem:[#allocation2 + $0x18] sm:$0xff]  ;;  %v531_v43 = vld [vmem:[#allocation2 + $0x20] sm:$0xff]  ;;  %vm702_vm3 = vcmask 130048  }
 0x16c   : > { %v529_v36 = vld [vmem:[#allocation2 + $0x10] sm:$0xff]  ;;  %1060 = vset.pattern.permute.xlu1 %v1231_v37  ;;  %1049 = vset.pattern.permute.xlu0 %v1231_v37  ;;  %v541_v38 = vmul.f32 0.00390625, %v533_v34  ;;  %v538_v42 = vmul.f32 0.00390625, %v530_v40  ;;  %v532_v44 = vld [vmem:[#allocation2 + $0x28] sm:$0xff]  ;;  %v527_v46 = vld [vmem:[#allocation2] sm:$0xff]  ;;  %v539_v49 = vmul.f32 0.00390625, %v531_v43 }
 0x16d   : > { %v537_v41 = vmul.f32 0.00390625, %v529_v36  ;;  %1071 = vset.pattern.permute.xlu2 %v1231_v37  ;;  %v528_v47 = vld [vmem:[#allocation2 + $0x8] sm:$0xff]  ;;  %v540_v50 = vmul.f32 0.00390625, %v532_v44  ;;  %v535_v51 = vmul.f32 0.00390625, %v527_v46  ;;  %v595_v55 = vld [vmem:[%s1639_s6] sm:$0xff]  ;;  %v598_v57 = vld [vmem:[%s1639_s6 + $0x18] sm:$0xff] }
 0x16e   : > { %v536_v52 = vmul.f32 0.00390625, %v528_v47  ;;  %v596_v56 = vld [vmem:[%s1639_s6 + $0x8] sm:$0xff]  ;;  %v599_v58 = vld [vmem:[%s1639_s6 + $0x20] sm:$0xff]  ;;  %v601_v59 = vld [vmem:[%s1639_s6 + $0x30] sm:$0xff] }
 0x16f   : > { %v1061_v48 = vpack.i.bf16 %v538_v42, %v537_v41  ;;  %v1055_v53 = vpack.i.bf16 %v540_v50, %v539_v49  ;;  %v602_v60 = vld [vmem:[%s1639_s6 + $0x38] sm:$0xff]  ;;  %v585_v0 = vld [vmem:[%s1637_s4] sm:$0xff]  ;;  %v586_v8 = vld [vmem:[%s1637_s4 + $0x8] sm:$0xff] }
 0x170   : > { %v1066_v54 = vpack.i.bf16 %v536_v52, %v535_v51  ;;  %609 = vperm.xlu2 %1071, %v585_v0   ;;  %v597_v17 = vld [vmem:[%s1639_s6 + $0x10] sm:$0xff]  ;;  %v904_v3 = vld [vmem:[%s1636_s3] sm:$0xff]  ;;  %v600_v19 = vld [vmem:[%s1639_s6 + $0x28] sm:$0xff] }
 0x171   : > { %v534_v35 = vld [vmem:[#allocation2 + $0x38] sm:$0xff]  ;;  %1062 = vperm.xlu1 %1060, %v1061_v48   ;;  %v905_v27 = vld [vmem:[%s1638_s5] sm:$0xff]  ;;  %v906_v28 = vld [vmem:[%s1638_s5 + $0x8] sm:$0xff] }
 0x172   : > { %v542_v39 = vmul.f32 0.00390625, %v534_v35  ;;  %v908_v29 = vld [vmem:[%s1638_s5 + $0x18] sm:$0xff]  ;;  %v907_v30 = vld [vmem:[%s1638_s5 + $0x10] sm:$0xff] }
 0x174   : > { %v1050_v45 = vpack.i.bf16 %v542_v39, %v541_v38 }
 0x176   : > { %1051 = vperm.xlu0 %1049, %v1050_v45  }
 0x178   : > { %614 = vperm.xlu2 %1071, %v586_v8  }
 0x179   : > { %1067 = vperm.xlu1 %1060, %v1066_v54  }
 0x17e   : > { %1056 = vperm.xlu0 %1049, %v1055_v53  }
 0x180   : > { %654 = vperm.xlu2 %1071, %v597_v17  }
 0x181   : > { %649 = vperm.xlu1 %1060, %v596_v56  }
 0x186   : > { %644 = vperm.xlu0 %1049, %v595_v55  }
 0x188   : > { %669 = vperm.xlu2 %1071, %v600_v19  }
 0x189   : > { %664 = vperm.xlu1 %1060, %v599_v58  }
 0x18e   : > { %659 = vperm.xlu0 %1049, %v598_v57  }
 0x191   : > { %679 = vperm.xlu1 %1060, %v602_v60  }
 0x196   : > { %674 = vperm.xlu0 %1049, %v601_v59  }
 0x1ca   : > { %v610_v5 = vpop.permute.xlu2 %609 }
 0x1d2   : > { %v615_v22 = vpop.permute.xlu2 %614 }
 0x1da   : > { %v655_v37 = vpop.permute.xlu2 %654 }
 0x1e2   : > { %v670_v52 = vpop.permute.xlu2 %669 }
 0x1e3   : > { %v1063_v6 = vpop.permute.xlu1 %1062 }
 0x1e4   : > { %v1065_v12 = vunpack.i.h.bf16 %v1063_v6  ;;  %v1064_v9 = vunpack.i.l.bf16 %v1063_v6 }
 0x1e6   : > { %v604_v16 = vpack.c.bf16 %v1065_v12, %v1064_v9 }
 0x1e8   : > { %v1052_v61 = vpop.permute.xlu0 %1051 }
 0x1e9   : > { %v1054_v62 = vunpack.i.h.bf16 %v1052_v61  ;;  %v1053_v63 = vunpack.i.l.bf16 %v1052_v61 }
 0x1eb   : > { %v606_v7 = vpack.c.bf16 %v1054_v62, %v1053_v63  ;;  %v1068_v13 = vpop.permute.xlu1 %1067 }
 0x1ec   : > { %v1070_v14 = vunpack.i.h.bf16 %v1068_v13  ;;  %v1069_v15 = vunpack.i.l.bf16 %v1068_v13 }
 0x1ed   : > { %629 = vmatpush.bf16.msra.mxu0 %v606_v7 }
 0x1ee   : > { %v603_v18 = vpack.c.bf16 %v1070_v14, %v1069_v15 }
 0x1f0   : > { %v1057_v10 = vpop.permute.xlu0 %1056 }
 0x1f1   : > { %v1059_v4 = vunpack.i.h.bf16 %v1057_v10  ;;  %v1058_v11 = vunpack.i.l.bf16 %v1057_v10 }
 0x1f3   : > { %v605_v2 = vpack.c.bf16 %v1059_v4, %v1058_v11  ;;  %v650_v32 = vpop.permute.xlu1 %649 }
 0x1f5   : > { %630 = vmatpush.bf16.msra.mxu0 %v605_v2 }
 0x1f8   : > { %v645_v31 = vpop.permute.xlu0 %644 }
 0x1f9   : > { %631 = vmatpush.bf16.msra.mxu0 %v604_v16 }
 0x1fb   : > { %v665_v36 = vpop.permute.xlu1 %664 }
 0x1fd   : > { %632 = vmatpush.bf16.msra.mxu0 %v603_v18 }
 0x200   : > { %878 = vmatmul.msk.bf16.vlgmr.msra.gmra.mxu0 %vm392_vm1, %v904_v3  ;;  %v660_v33 = vpop.permute.xlu0 %659 }
 0x203   : > { %v680_v46 = vpop.permute.xlu1 %679 }
 0x208   : > { %v675_v39 = vpop.permute.xlu0 %674 }
 0x27d   : > { %v634_v20 = vpop.f32.mrf.mxu0 }
 0x27e   : > { %v635_v21 = vadd.f32 %v634_v20, %v610_v5 }
 0x280   : > { %v639_v24 = vmax.f32 %v635_v21, 0.0 }
 0x285   : > { %v636_v23 = vpop.f32.mrf.mxu0 }
 0x286   : > { %v637_v1 = vadd.f32 %v636_v23, %v615_v22 }
 0x288   : > { %v640_v25 = vmax.f32 %v637_v1, 0.0 }
 0x28a   : > { %v641_v26 = vpack.c.bf16 %v640_v25, %v639_v24 }
 0x28c   : > { %722 = vmatpush.bf16.msra.mxu1 %v641_v26  ;;  %934 = vmatpush.bf16.msra.mxu2 %v641_v26 }
 0x28d   : > { %935 = vmatpush.bf16.msra.mxu3 %v641_v26 }
 0x28f   : > { %895 = vmatmul.msk.bf16.vlgmr.msra.gmra.mxu1 %vm702_vm3, %v905_v27  ;;  %896 = vmatmul.msk.bf16.vlgmr.msra.gmra.mxu2 %vm702_vm3, %v906_v28 }
 0x290   : > { %898 = vmatmul.msk.bf16.vlgmr.msra.gmra.mxu3 %vm702_vm3, %v908_v29 }
 0x29f   : > { %897 = vmatmul.msk.bf16.gmra.mxu2 %vm702_vm3, %v907_v30 }
 0x30c   : > { %v724_v34 = vpop.f32.mrf.mxu1 }
 0x30d   : > { %v725_v35 = vadd.f32 %v724_v34, %v645_v31 }
 0x30f   : > { %744 = vst [vmem:[%s1393_s26] sm:$0xff] %v725_v35 }
 0x312   : > { %v729_v38 = vpop.f32.mrf.mxu2 }
 0x313   : > { %v730_v40 = vadd.f32 %v729_v38, %v655_v37  ;;  %v739_v41 = vpop.f32.mrf.mxu3 }
 0x314   : > { %v740_v42 = vadd.f32 %v739_v41, %v675_v39  ;;  %v726_v43 = vpop.f32.mrf.mxu1 }
 0x315   : > { %746 = vst [vmem:[%s1393_s26 + $0x10] sm:$0xff] %v730_v40  ;;  %v727_v44 = vadd.f32 %v726_v43, %v650_v32 }
 0x316   : > { %750 = vst [vmem:[%s1393_s26 + $0x30] sm:$0xff] %v740_v42 }
 0x317   : > { %745 = vst [vmem:[%s1393_s26 + $0x8] sm:$0xff] %v727_v44 }
 0x31a   : > { %v731_v45 = vpop.f32.mrf.mxu2 }
 0x31b   : > { %v732_v47 = vadd.f32 %v731_v45, %v660_v33  ;;  %v741_v48 = vpop.f32.mrf.mxu3 }
 0x31c   : > { %v742_v49 = vadd.f32 %v741_v48, %v680_v46 }
 0x31d   : > { %747 = vst [vmem:[%s1393_s26 + $0x18] sm:$0xff] %v732_v47 }
 0x31e   : > { %751 = vst [vmem:[%s1393_s26 + $0x38] sm:$0xff] %v742_v49 }
 0x322   : > { %v734_v50 = vpop.f32.mrf.mxu2 }
 0x323   : > { %v735_v51 = vadd.f32 %v734_v50, %v665_v36 }
 0x325   : > { %748 = vst [vmem:[%s1393_s26 + $0x20] sm:$0xff] %v735_v51 }
 0x32a   : > { %v736_v53 = vpop.f32.mrf.mxu2 }
 0x32b   : > { %v737_v54 = vadd.f32 %v736_v53, %v670_v52 }
 0x32d   : > { %749 = vst [vmem:[%s1393_s26 + $0x28] sm:$0xff] %v737_v54 }
 0x32e PF: > { %s1663_s29 = sld [smem:[#allocation11_spill]]  ;;  %s765_s12 = sshll.u32 %s1393_s26, 4  ;;  %s766_s12 = int_to_ptr.vmem [resolvable:$true] %s765_s12 }
 0x32f   : > { %s1665_s23 = sld [smem:[#allocation18_spill]]  ;;  %s753_s16 = scalar_lea.sflag [#allocation5], %s311_s8 }
 0x334   : > { %s909_s30 = sshll.u32 %s1663_s29, 6 }
 0x335   : > { %s764_s27 = scalar_lea.hbm %s1665_s23, %s909_s30  ;;  %s1122_s22 = scalar_lea.hbm %s1665_s23, 128 }
 0x336   : > { %s767_s19 = sshll.u32 %s764_s27, 4  ;;  %s768_s19 = int_to_ptr.hbm [resolvable:$true] %s767_s19 }
 0x337   : > { %s1116_s13 = sshra.s32 %s768_s19, 4  ;;  %s1117_s13 = int_to_ptr.hbm [resolvable:$true] %s1116_s13 }
 0x338   : > { %s1118_s15 = scalar_lea.hbm %s1117_s13, 64  ;;  %p1123_p13 = scmp.lt.s32.totalorder %s1117_s13, %s1665_s23 }
 0x339   : > { %p1119_p9 = scmp.ne.s32.totalorder %s1117_s13, %s1118_s15  ;;  %p1124_p0 = scmp.lt.s32.totalorder %s1122_s22, %s1118_s15 }
 0x33b   : > { %p1120_p10 = pnand %p1119_p9, %p1356_p12  ;;  %p1125_p1 = por %p1124_p0, %p1123_p13 }
 0x33d   : > { %p1121_p11 = pneg %p1120_p10 }
 0x33f   : > { %p1126_p4 = pnand %p1125_p1, %p1121_p11 }
 0x341   : > { %1129 = shalt.err (!%p1126_p4)
}
 0x342   : > { %s1232_s8 = smov 128   ;;  %s1233_s26 = smov 8  }
 0x343   : > { %938 = dma.vmem_to_hbm [thread:$0]  (%p1356_p12), %s766_s12, 1024, %s768_s19, %s753_s16, %s1232_s8, %s1232_s8, %s1233_s26  }
 0x344 PF: > { %p949_p5 = scmp.ge.s32.totalorder %s1224_s11, 2  ;;  %s782_s18 = sand.u32 1, %s1184_s24  }
 0x345   : > { %s783_s20 = scalar_lea.sflag [#allocation5], %s782_s18 }
 0x346   : > { %p945_p6 = pnand %p949_p5, %p1369_p2 }
 0x348   : > { %p946_p8 = pneg %p945_p6 }
 0x34a   : > { %1179 = dma.done.wait (%p946_p8), %s783_s20, 1024  }
 0x34b   : > { %1181 = vsyncadd (%p946_p8), %s783_s20, 4294966272  ;;  %s23_s11 = sadd.s32 1, %s1224_s11   ;;  %s1667_s27 = sld [smem:[#allocation9_spill]] }
 0x34c   : > { %p20_p3 = scmp.ge.s32.totalorder %s23_s11, 6   ;;  %s1668_s26 = sld [smem:[#allocation15_spill]] }
 0x34d   : > { %s1669_s14 = sld [smem:[#allocation10_spill]]  ;;  %s1673_s24 = smov %s1188_s25 }
 0x34e   : > { %s1670_s29 = sld [smem:[#allocation16_spill]]  ;;  %s1677_s30 = smov %s1216_s9 }
 0x34f   : > { %s1671_s12 = sld [smem:[#allocation12_spill]]  ;;  %s1678_s8 = smov %s1220_s10 }
 0x350   : > { %s1672_s19 = sld [smem:[#allocation13_spill]] }
 0x351   : > { %s1674_s25 = smov %s1667_s27  ;;  %s1675_s27 = smov %s1200_s28 }
 0x352   :  { %22 = sbr.rel (!%p20_p3) target bundleno = 11 (0xb), region = 101 }
 0x353   : > { %s1676_s28 = smov %s1669_s14 }
 0x355   : > { %s1679_s9 = smov %s1671_s12 }
 0x356   : > { %s1680_s10 = smov %s1672_s19 }
 0x357   :  { %789 = vsyncpa [#allocation4], 1 }
 0x358   :  { %791 = vsyncpa [#allocation4 + $0x1], 1 }
 0x359   :  { %792 = vsyncpa [#allocation5], 1 }
 0x35a   :  { %794 = vsyncpa [#allocation5 + $0x1], 1 }

// kernel: tpu_custom_call.1
= control target key start
LH: loop header
LB: loop body
LE: loop exit
PB: predicated region body
PF: predicated region fallthrough
CT: control target
= control target key end

     0   :  { %s1633_s0 = inlined_call_operand.hbm [shape: f32[2,64,256], index: 0, kind: input, shape index: {}]   ;;  %s1634_s1 = inlined_call_operand.vmem [shape: f32[64,64], index: 1, kind: input, shape index: {}]   ;;  %s1635_s2 = inlined_call_operand.vmem [shape: f32[64,1], index: 2, kind: input, shape index: {}]   ;;  %s1636_s3 = inlined_call_operand.vmem [shape: bf16[16,64], index: 3, kind: input, shape index: {}]   ;;  %s1637_s4 = inlined_call_operand.vmem [shape: f32[16,1], index: 4, kind: input, shape index: {}]   ;;  %s1638_s5 = inlined_call_operand.vmem [shape: bf16[64,16], index: 5, kind: input, shape index: {}]   ;;  %s1639_s6 = inlined_call_operand.vmem [shape: f32[64,1], index: 6, kind: input, shape index: {}]   ;;  %s1640_s7 = inlined_call_operand.hbm [shape: f32[2,64,128], index: 7, kind: output, shape index: {}]  }
   0x1   :  { %1649 = sst [smem:[#allocation18_spill]] %s1640_s7 }
   0x2   :  { %12 = vsyncpa [#allocation4], 0 }
   0x3   :  { %14 = vsyncpa [#allocation4 + $0x1], 0 }
   0x4   :  { %15 = vsyncpa [#allocation5], 0 }
   0x5   :  { %17 = vsyncpa [#allocation5 + $0x1], 0  ;;  %s1274_s24 = smov 0   ;;  %s1276_s25 = smov 0  }
   0x6   :  { %s1278_s26 = smov 0   ;;  %s1280_s27 = smov 0  }
   0x7   :  { %s1282_s28 = smov 0   ;;  %s1284_s29 = smov 0  }
   0x8   :  { %s1286_s30 = smov 0   ;;  %s1288_s8 = smov 0  }
   0x9   :  { %s1290_s9 = smov 0   ;;  %s1292_s10 = smov 0  }
   0xa   :  { %s1294_s11 = smov 0  }
   0xb LB: > { %1650 = sst [smem:[#allocation9_spill]] %s1192_s26  ;;  %s854_s12 = sadd.s32 4294967295, %s1224_s11   ;;  %s1224_s11 = sphi %s1294_s11, %s23_s11   ;;  %s1220_s10 = sphi %s1292_s10, %s1680_s10   ;;  %s1216_s9 = sphi %s1290_s9, %s1679_s9   ;;  %s1212_s8 = sphi %s1288_s8, %s1678_s8   ;;  %s1208_s30 = sphi %s1286_s30, %s1677_s30   ;;  %s1204_s29 = sphi %s1284_s29, %s1670_s29   ;;  %s1200_s28 = sphi %s1282_s28, %s1676_s28   ;;  %s1196_s27 = sphi %s1280_s27, %s1675_s27   ;;  %s1192_s26 = sphi %s1278_s26, %s1668_s26   ;;  %s1188_s25 = sphi %s1276_s25, %s1674_s25   ;;  %s1184_s24 = sphi %s1274_s24, %s1673_s24  }
   0xc   : > { %1651 = sst [smem:[#allocation10_spill]] %s1204_s29  ;;  %s855_s13 = sadd.s32 4294967294, %s1224_s11  }
   0xd   : > { %1652 = sst [smem:[#allocation11_spill]] %s1212_s8  ;;  %s32_s14 = sadd.s32 1, %s1216_s9 }
   0xe   : > { %s35_s15 = sadd.s32 1, %s1220_s10  ;;  %p33_p0 = scmp.ge.s32.totalorder %s32_s14, 2 }
   0xf   : > { %s44_s16 = sadd.s32 1, %s1204_s29  ;;  %p51_p1 = scmp.ne.s32.totalorder %s1204_s29, %s1200_s28 }
  0x10   : > { %p52_p2 = scmp.eq.s32.totalorder %s1224_s11, 0  ;;  %s1682_s14 = smov (%p33_p0, %s32_s14), 0 }
  0x11   : > { %1653 = sst [smem:[#allocation12_spill]] %s1682_s14  ;;  %s1684_s15 = smov (!%p33_p0, %s35_s15), %s1220_s10 }
  0x12   : > { %s40_s17 = ssub.s32 %s1216_s9, %s1682_s14  ;;  %p1340_p3 = por %p52_p2, %p51_p1 }
  0x13   : > { %p37_p4 = scmp.ge.s32.totalorder %s1684_s15, 2  ;;  %p57_p5 = scmp.ne.s32.totalorder %s1200_s28, %s1196_s27 }
  0x14   : > { %p58_p6 = scmp.eq.s32.totalorder %s854_s12, 0  ;;  %s196_s19 = sadd.s32 1, %s1192_s26 }
  0x15   : > { %s1686_s15 = smov (%p37_p4, %s1684_s15), 0  ;;  %p206_p8 = scmp.ne.s32.totalorder %s1192_s26, %s1188_s25 }
  0x16   : > { %1655 = sst [smem:[#allocation13_spill]] %s1686_s15  ;;  %p1348_p7 = por %p58_p6, %p57_p5 }
  0x17   : > { %s39_s21 = ssub.s32 %s1220_s10, %s1686_s15  ;;  %p207_p9 = scmp.eq.s32.totalorder %s854_s12, 3 }
  0x18   : > { %s41_s22 = sor.u32 %s40_s17, %s39_s21  ;;  %p194_p10 = scmp.eq.s32.totalorder %s39_s21, 0 }
  0x19   : > { %p42_p11 = scmp.eq.s32.totalorder %s41_s22, 0  ;;  %p1356_p12 = por %p207_p9, %p206_p8 }
  0x1a   : > { %s1361_s27 = scalar_select %p194_p10, %s1192_s26, %s196_s19  }
  0x1b   : > { %s1657_s23 = scalar_select %p1356_p12, 1, 0 }
  0x1c   : > { %1659 = sst [smem:[#allocation15_spill]] %s1361_s27  ;;  %p212_p13 = scmp.ne.s32.totalorder %s1188_s25, %s1184_s24 }
  0x1d   : > { %1658 = sst [smem:[#allocation14_spill]] %s1657_s23  ;;  %p213_p0 = scmp.eq.s32.totalorder %s855_s13, 3 }
  0x1e   : > { %s1364_s14 = scalar_select %p42_p11, %s1204_s29, %s44_s16  }
  0x1f   : > { %p948_p1 = scmp.lt.s32.totalorder %s1224_s11, 4  ;;  %p1369_p2 = por %p213_p0, %p212_p13 }
  0x20   : > { %1660 = sst [smem:[#allocation16_spill]] %s1364_s14  ;;  %s251_s12 = sand.u32 1, %s1204_s29  }
  0x21   : > { %s1661_s7 = scalar_select %p1369_p2, 1, 0 }
  0x22   : > { %s858_s17 = sshll.u32 %s251_s12, 6  ;;  %s859_s21 = sshll.u32 %s1220_s10, 4 }
  0x23   : > { %1662 = sst [smem:[#allocation17_spill]] %s1661_s7  ;;  %s259_s22 = sadd.s32 %s1216_s9, %s859_s21 }
  0x24   : > { %s255_s15 = scalar_lea.vmem [#allocation3], %s858_s17  ;;  %s860_s8 = sshll.u32 %s259_s22, 3 }
  0x25   : > { %s264_s23 = sshll.u32 %s255_s15, 4  ;;  %s261_s14 = scalar_lea.hbm %s1633_s0, %s860_s8  ;;  %s265_s23 = int_to_ptr.vmem [resolvable:$true] %s264_s23 }
  0x26   : > { %p941_p4 = pnand %p948_p1, %p1340_p3  ;;  %s262_s13 = sshll.u32 %s261_s14, 4  ;;  %s263_s13 = int_to_ptr.hbm [resolvable:$true] %s262_s13 }
  0x27   : > { %s252_s27 = scalar_lea.sflag [#allocation4], %s251_s12  ;;  %s1226_s26 = smov 256  }
  0x28   : > { %s1227_s29 = smov 128   ;;  %s1228_s7 = smov 8  }
  0x29   : > { %943 = dma.hbm_to_vmem [thread:$0]  (!%p941_p4), %s263_s13, 1024, %s265_s23, %s252_s27, %s1226_s26, %s1227_s29, %s1228_s7  }
  0x2a   : > { %p861_p5 = scmp.ge.s32.totalorder %s1224_s11, 1  ;;  %p272_p6 = scmp.lt.s32.totalorder %s1224_s11, 5 }
  0x2c   : > { %p273_p8 = pnand %p861_p5, %p272_p6 }
  0x2d   : > { %s278_s15 = sand.u32 (!%p273_p8), 1, %s1200_s28  }
  0x2e   : > { %276 = sbr.rel (%p273_p8) target bundleno = 836 (0x344), region = 48  ;;  %s862_s17 = sshll.u32 (!%p273_p8), %s278_s15, 6 }
  0x2f   : > { %s279_s21 = scalar_lea.sflag (!%p273_p8), [#allocation4], %s278_s15  ;;  %s1384_s22 = scalar_lea.vmem (!%p273_p8), [#allocation3], %s862_s17 }
  0x33   : > { %1175 = dma.done.wait (%p1348_p7), %s279_s21, 1024  }
  0x34   : > { %1177 = vsyncadd (%p1348_p7), %s279_s21, 4294966272  ;;  %s311_s8 = sand.u32 1, %s1188_s25   ;;  %p864_p3 = scmp.ne.s32.totalorder %s1208_s30, 0 }
  0x35   : > { %s863_s7 = sshll.u32 %s311_s8, 6 }
  0x36   : > { %s1393_s26 = scalar_lea.vmem [#allocation6], %s863_s7  ;;  %318 = sbr.rel (%p864_p3) target bundleno = 68 (0x44), region = 56 }
  0x3b   : > { %vm319_vm0 = vcmask 7168   ;;  %v1229_v0 = vmov 0.0  }
  0x3c   : > { %320 = vst.msk [vmem:[#allocation2] sm:$0xff] %vm319_vm0, %v1229_v0 }
  0x3d   : > { %321 = vst.msk [vmem:[#allocation2 + $0x8] sm:$0xff] %vm319_vm0, %v1229_v0 }
  0x3e   : > { %322 = vst.msk [vmem:[#allocation2 + $0x10] sm:$0xff] %vm319_vm0, %v1229_v0 }
  0x3f   : > { %323 = vst.msk [vmem:[#allocation2 + $0x18] sm:$0xff] %vm319_vm0, %v1229_v0 }
  0x40   : > { %324 = vst.msk [vmem:[#allocation2 + $0x20] sm:$0xff] %vm319_vm0, %v1229_v0 }
  0x41   : > { %325 = vst.msk [vmem:[#allocation2 + $0x28] sm:$0xff] %vm319_vm0, %v1229_v0 }
  0x42   : > { %326 = vst.msk [vmem:[#allocation2 + $0x30] sm:$0xff] %vm319_vm0, %v1229_v0 }
  0x43   : > { %327 = vst.msk [vmem:[#allocation2 + $0x38] sm:$0xff] %vm319_vm0, %v1229_v0 }
  0x44 PF: > { %v1397_v1 = vld [vmem:[%s1384_s22 + $0x38] sm:$0xff]  ;;  %v1400_v2 = vld [vmem:[%s1384_s22 + $0x30] sm:$0xff]  ;;  %v1407_v3 = vld [vmem:[%s1384_s22 + $0x28] sm:$0xff]  ;;  %v1230_v8 = vmov 0   ;;  %vm392_vm1 = vcmask 523264   ;;  %vm514_vm2 = vcmask 7168  }
  0x45   : > { %425 = vmatpush.msra.mxu0 %v1397_v1  ;;  %910 = vmatpush.msra.mxu1 %v1397_v1  ;;  %v1414_v4 = vld [vmem:[%s1384_s22 + $0x20] sm:$0xff]  ;;  %v1421_v5 = vld [vmem:[%s1384_s22 + $0x18] sm:$0xff]  ;;  %v1428_v6 = vld [vmem:[%s1384_s22 + $0x10] sm:$0xff]  ;;  %p873_p7 = scmp.ne.s32.totalorder %s1208_s30, 1 }
  0x46   : > { %911 = vmatpush.msra.mxu2 %v1397_v1  ;;  %912 = vmatpush.msra.mxu3 %v1397_v1  ;;  %v344_v7 = vld [vmem:[%s1635_s2] sm:$0xff]  ;;  %v1439_v9 = vld [vmem:[%s1384_s22 + $0x8] sm:$0xff]  ;;  %v338_v12 = vld [vmem:[%s1634_s1 + $0x10] sm:$0xff] }
  0x47   : > { %426 = vmatpush.msra.mxu0 %v1400_v2  ;;  %913 = vmatpush.msra.mxu1 %v1400_v2  ;;  %v328_v10 = vld [vmem:[%s1384_s22] sm:$0xff]  ;;  %v342_v14 = vld [vmem:[%s1634_s1 + $0x30] sm:$0xff]  ;;  %v345_v15 = vld [vmem:[%s1635_s2 + $0x8] sm:$0xff] }
  0x48   : > { %914 = vmatpush.msra.mxu2 %v1400_v2  ;;  %915 = vmatpush.msra.mxu3 %v1400_v2  ;;  %v336_v11 = vld [vmem:[%s1634_s1] sm:$0xff]  ;;  %v346_v16 = vld [vmem:[%s1635_s2 + $0x10] sm:$0xff]  ;;  %v337_v18 = vld [vmem:[%s1634_s1 + $0x8] sm:$0xff] }
  0x49   : > { %427 = vmatpush.msra.mxu0 %v1407_v3  ;;  %916 = vmatpush.msra.mxu1 %v1407_v3  ;;  %v340_v13 = vld [vmem:[%s1634_s1 + $0x20] sm:$0xff]  ;;  %v339_v19 = vld [vmem:[%s1634_s1 + $0x18] sm:$0xff]  ;;  %v341_v20 = vld [vmem:[%s1634_s1 + $0x28] sm:$0xff] }
  0x4a   : > { %917 = vmatpush.msra.mxu2 %v1407_v3  ;;  %918 = vmatpush.msra.mxu3 %v1407_v3  ;;  %v348_v17 = vld [vmem:[%s1635_s2 + $0x20] sm:$0xff]  ;;  %v343_v21 = vld [vmem:[%s1634_s1 + $0x38] sm:$0xff]  ;;  %v350_v22 = vld [vmem:[%s1635_s2 + $0x30] sm:$0xff] }
  0x4b   : > { %428 = vmatpush.msra.mxu0 %v1414_v4  ;;  %919 = vmatpush.msra.mxu1 %v1414_v4  ;;  %v347_v23 = vld [vmem:[%s1635_s2 + $0x18] sm:$0xff]  ;;  %v349_v24 = vld [vmem:[%s1635_s2 + $0x28] sm:$0xff] }
  0x4c   : > { %920 = vmatpush.msra.mxu2 %v1414_v4  ;;  %921 = vmatpush.msra.mxu3 %v1414_v4  ;;  %v351_v25 = vld [vmem:[%s1635_s2 + $0x38] sm:$0xff] }
  0x4d   : > { %429 = vmatpush.msra.mxu0 %v1421_v5  ;;  %922 = vmatpush.msra.mxu1 %v1421_v5 }
  0x4e   : > { %923 = vmatpush.msra.mxu2 %v1421_v5  ;;  %924 = vmatpush.msra.mxu3 %v1421_v5 }
  0x4f   : > { %1046 = vset.pattern.permute.xlu0 %v1230_v8  ;;  %430 = vmatpush.msra.mxu0 %v1428_v6 }
  0x50   : > { %354 = vperm.xlu0 %1046, %v344_v7   ;;  %925 = vmatpush.msra.mxu1 %v1428_v6 }
  0x51   : > { %926 = vmatpush.msra.mxu2 %v1428_v6  ;;  %927 = vmatpush.msra.mxu3 %v1428_v6 }
  0x52   : > { %431 = vmatpush.msra.mxu0 %v1439_v9  ;;  %928 = vmatpush.msra.mxu1 %v1439_v9 }
  0x53   : > { %929 = vmatpush.msra.mxu2 %v1439_v9  ;;  %930 = vmatpush.msra.mxu3 %v1439_v9 }
  0x54   : > { %432 = vmatpush.msra.mxu0 %v328_v10  ;;  %931 = vmatpush.msra.mxu1 %v328_v10 }
  0x55   : > { %932 = vmatpush.msra.mxu2 %v328_v10  ;;  %933 = vmatpush.msra.mxu3 %v328_v10 }
  0x56   : > { %865 = vmatmul.msk.f32.vlgmr.msra.gmra.mxu0 %vm392_vm1, %v336_v11  ;;  %867 = vmatmul.msk.f32.vlgmr.msra.gmra.mxu1 %vm392_vm1, %v338_v12 }
  0x57   : > { %869 = vmatmul.msk.f32.vlgmr.msra.gmra.mxu2 %vm392_vm1, %v340_v13  ;;  %871 = vmatmul.msk.f32.vlgmr.msra.gmra.mxu3 %vm392_vm1, %v342_v14  ;;  %v482_v13 = vld [vmem:[#allocation2] sm:$0xff]  ;;  %v484_v14 = vld [vmem:[#allocation2 + $0x10] sm:$0xff] }
  0x58   : > { %1047 = vset.pattern.permute.xlu1 %v1230_v8  ;;  %359 = vperm.xlu0 %1046, %v345_v15  }
  0x59   : > { %364 = vperm.xlu1 %1047, %v346_v16   ;;  %1048 = vset.pattern.permute.xlu2 %v1230_v8 }
  0x5a   : > { %374 = vperm.xlu2 %1048, %v348_v17  }
  0x5e   : > { %866 = vmatmul.msk.f32.gmra.mxu0 %vm392_vm1, %v337_v18  ;;  %868 = vmatmul.msk.f32.gmra.mxu1 %vm392_vm1, %v339_v19  ;;  %v486_v19 = vld [vmem:[#allocation2 + $0x20] sm:$0xff] }
  0x5f   : > { %870 = vmatmul.msk.f32.gmra.mxu2 %vm392_vm1, %v341_v20  ;;  %872 = vmatmul.msk.f32.gmra.mxu3 %vm392_vm1, %v343_v21 }
  0x60   : > { %384 = vperm.xlu0 %1046, %v350_v22  }
  0x61   : > { %369 = vperm.xlu1 %1047, %v347_v23  }
  0x62   : > { %379 = vperm.xlu2 %1048, %v349_v24  }
  0x69   : > { %389 = vperm.xlu1 %1047, %v351_v25   ;;  %v487_v25 = vld [vmem:[#allocation2 + $0x28] sm:$0xff] }
  0xb4   : > { %v375_v35 = vpop.permute.xlu2 %374 }
  0xbc   : > { %v380_v57 = vpop.permute.xlu2 %379 }
  0xc2   : > { %v355_v26 = vpop.permute.xlu0 %354 }
  0xca   : > { %v360_v27 = vpop.permute.xlu0 %359 }
  0xcb   : > { %v365_v28 = vpop.permute.xlu1 %364 }
  0xd2   : > { %v385_v37 = vpop.permute.xlu0 %384 }
  0xd3   : > { %v434_v29 = vpop.f32.mrf.mxu0  ;;  %v440_v31 = vpop.f32.mrf.mxu1 }
  0xd4   : > { %v435_v30 = vadd.f32 %v434_v29, %v355_v26  ;;  %v441_v32 = vadd.f32 %v440_v31, %v365_v28  ;;  %v370_v42 = vpop.permute.xlu1 %369  ;;  %v485_v26 = vld [vmem:[#allocation2 + $0x18] sm:$0xff] }
  0xd5   : > { %v489_v31 = vld [vmem:[#allocation2 + $0x38] sm:$0xff] }
  0xd6   : > { %v458_v33 = vadd.f32 %v435_v30, %v328_v10  ;;  %v460_v34 = vadd.f32 %v441_v32, %v1428_v6 }
  0xd8   : > { %v466_v36 = vmax.f32 %v458_v33, 0.0  ;;  %v468_v38 = vmax.f32 %v460_v34, 0.0 }
  0xda   : > { %v446_v39 = vpop.f32.mrf.mxu2  ;;  %v452_v40 = vpop.f32.mrf.mxu3  ;;  %v474_v41 = vadd.f32 %v466_v36, %v328_v10  ;;  %v476_v46 = vadd.f32 %v468_v38, %v1428_v6 }
  0xdb   : > { %v447_v43 = vadd.f32 %v446_v39, %v375_v35  ;;  %v453_v44 = vadd.f32 %v452_v40, %v385_v37  ;;  %v437_v45 = vpop.f32.mrf.mxu0  ;;  %v443_v48 = vpop.f32.mrf.mxu1 }
  0xdc   : > { %v438_v47 = vadd.f32 %v437_v45, %v360_v27  ;;  %490 = vadd.xlane.f32.xlu2 %v474_v41  ;;  %494 = vadd.xlane.f32.xlu1 %v476_v46  ;;  %v444_v52 = vadd.f32 %v443_v48, %v370_v42  ;;  %v390_v0 = vpop.permute.xlu1 %389 }
  0xdd   : > { %v462_v49 = vadd.f32 %v447_v43, %v1414_v4  ;;  %v464_v50 = vadd.f32 %v453_v44, %v1400_v2 }
  0xde   : > { %v459_v51 = vadd.f32 %v438_v47, %v1439_v9  ;;  %v461_v58 = vadd.f32 %v444_v52, %v1421_v5 }
  0xdf   : > { %v470_v53 = vmax.f32 %v462_v49, 0.0  ;;  %v472_v54 = vmax.f32 %v464_v50, 0.0 }
  0xe0   : > { %v467_v55 = vmax.f32 %v459_v51, 0.0  ;;  %v469_v7 = vmax.f32 %v461_v58, 0.0 }
  0xe1   : > { %v478_v56 = vadd.f32 %v470_v53, %v1414_v4  ;;  %v480_v63 = vadd.f32 %v472_v54, %v1400_v2 }
  0xe2   : > { %v449_v59 = vpop.f32.mrf.mxu2  ;;  %v475_v60 = vadd.f32 %v467_v55, %v1439_v9  ;;  %v455_v62 = vpop.f32.mrf.mxu3  ;;  %v477_v12 = vadd.f32 %v469_v7, %v1421_v5  ;;  %v488_v5 = vld [vmem:[#allocation2 + $0x30] sm:$0xff] }
  0xe3   : > { %v450_v61 = vadd.f32 %v449_v59, %v380_v57  ;;  %v456_v8 = vadd.f32 %v455_v62, %v390_v0 }
  0xe4   : > { %492 = vadd.xlane.f32.xlu0 %v475_v60  ;;  %498 = vadd.xlane.f32.xlu2 %v478_v56 }
  0xe5   : > { %v463_v6 = vadd.f32 %v450_v61, %v1407_v3  ;;  %502 = vadd.xlane.f32.xlu1 %v480_v63  ;;  %v465_v4 = vadd.f32 %v456_v8, %v1397_v1 }
  0xe7   : > { %v471_v10 = vmax.f32 %v463_v6, 0.0  ;;  %v473_v9 = vmax.f32 %v465_v4, 0.0 }
  0xe9   : > { %v479_v11 = vadd.f32 %v471_v10, %v1407_v3  ;;  %v481_v2 = vadd.f32 %v473_v9, %v1397_v1  ;;  %v483_v3 = vld [vmem:[#allocation2 + $0x8] sm:$0xff] }
  0xec   : > { %500 = vadd.xlane.f32.xlu0 %v479_v11  ;;  %496 = vadd.xlane.f32.xlu2 %v477_v12 }
  0xf4   : > { %504 = vadd.xlane.f32.xlu2 %v481_v2 }
 0x14f   : > { %v491_v15 = vpop.xlane.xlu2 %490  ;;  %v495_v16 = vpop.xlane.xlu1 %494 }
 0x150   : > { %v506_v17 = vadd.f32 %v491_v15, %v482_v13  ;;  %v508_v18 = vadd.f32 %v495_v16, %v484_v14 }
 0x152   : > { %515 = vst.msk [vmem:[#allocation2] sm:$0xff] %vm514_vm2, %v506_v17 }
 0x153   : > { %517 = vst.msk [vmem:[#allocation2 + $0x10] sm:$0xff] %vm514_vm2, %v508_v18 }
 0x157   : > { %v493_v20 = vpop.xlane.xlu0 %492  ;;  %v499_v21 = vpop.xlane.xlu2 %498 }
 0x158   : > { %v503_v22 = vpop.xlane.xlu1 %502  ;;  %v507_v23 = vadd.f32 %v493_v20, %v483_v3  ;;  %v510_v1 = vadd.f32 %v499_v21, %v486_v19 }
 0x159   : > { %v512_v24 = vadd.f32 %v503_v22, %v488_v5 }
 0x15a   : > { %516 = vst.msk [vmem:[#allocation2 + $0x8] sm:$0xff] %vm514_vm2, %v507_v23 }
 0x15b   : > { %521 = vst.msk [vmem:[#allocation2 + $0x30] sm:$0xff] %vm514_vm2, %v512_v24 }
 0x15c   : > { %519 = vst.msk [vmem:[#allocation2 + $0x20] sm:$0xff] %vm514_vm2, %v510_v1 }
 0x15f   : > { %v501_v27 = vpop.xlane.xlu0 %500  ;;  %v497_v28 = vpop.xlane.xlu2 %496 }
 0x160   : > { %v511_v29 = vadd.f32 %v501_v27, %v487_v25  ;;  %v509_v30 = vadd.f32 %v497_v28, %v485_v26 }
 0x162   : > { %520 = vst.msk [vmem:[#allocation2 + $0x28] sm:$0xff] %vm514_vm2, %v511_v29 }
 0x163   : > { %518 = vst.msk [vmem:[#allocation2 + $0x18] sm:$0xff] %vm514_vm2, %v509_v30 }
 0x166   : > { %526 = sbr.rel (%p873_p7) target bundleno = 814 (0x32e), region = 60 }
 0x167   : > { %v505_v32 = vpop.xlane.xlu2 %504 }
 0x168   : > { %v513_v33 = vadd.f32 %v505_v32, %v489_v31 }
 0x16a   : > { %522 = vst.msk [vmem:[#allocation2 + $0x38] sm:$0xff] %vm514_vm2, %v513_v33 }
 0x16b   : > { %v533_v34 = vld [vmem:[#allocation2 + $0x30] sm:$0xff]  ;;  %v1231_v37 = vmov 0   ;;  %v530_v40 = vld [vmem:[#allocation2 + $0x18] sm:$0xff]  ;;  %v531_v43 = vld [vmem:[#allocation2 + $0x20] sm:$0xff]  ;;  %vm702_vm3 = vcmask 130048  }
 0x16c   : > { %v529_v36 = vld [vmem:[#allocation2 + $0x10] sm:$0xff]  ;;  %1060 = vset.pattern.permute.xlu1 %v1231_v37  ;;  %1049 = vset.pattern.permute.xlu0 %v1231_v37  ;;  %v541_v38 = vmul.f32 0.00390625, %v533_v34  ;;  %v538_v42 = vmul.f32 0.00390625, %v530_v40  ;;  %v532_v44 = vld [vmem:[#allocation2 + $0x28] sm:$0xff]  ;;  %v527_v46 = vld [vmem:[#allocation2] sm:$0xff]  ;;  %v539_v49 = vmul.f32 0.00390625, %v531_v43 }
 0x16d   : > { %v537_v41 = vmul.f32 0.00390625, %v529_v36  ;;  %1071 = vset.pattern.permute.xlu2 %v1231_v37  ;;  %v528_v47 = vld [vmem:[#allocation2 + $0x8] sm:$0xff]  ;;  %v540_v50 = vmul.f32 0.00390625, %v532_v44  ;;  %v535_v51 = vmul.f32 0.00390625, %v527_v46  ;;  %v595_v55 = vld [vmem:[%s1639_s6] sm:$0xff]  ;;  %v598_v57 = vld [vmem:[%s1639_s6 + $0x18] sm:$0xff] }
 0x16e   : > { %v536_v52 = vmul.f32 0.00390625, %v528_v47  ;;  %v596_v56 = vld [vmem:[%s1639_s6 + $0x8] sm:$0xff]  ;;  %v599_v58 = vld [vmem:[%s1639_s6 + $0x20] sm:$0xff]  ;;  %v601_v59 = vld [vmem:[%s1639_s6 + $0x30] sm:$0xff] }
 0x16f   : > { %v1061_v48 = vpack.i.bf16 %v538_v42, %v537_v41  ;;  %v1055_v53 = vpack.i.bf16 %v540_v50, %v539_v49  ;;  %v602_v60 = vld [vmem:[%s1639_s6 + $0x38] sm:$0xff]  ;;  %v585_v0 = vld [vmem:[%s1637_s4] sm:$0xff]  ;;  %v586_v8 = vld [vmem:[%s1637_s4 + $0x8] sm:$0xff] }
 0x170   : > { %v1066_v54 = vpack.i.bf16 %v536_v52, %v535_v51  ;;  %609 = vperm.xlu2 %1071, %v585_v0   ;;  %v597_v17 = vld [vmem:[%s1639_s6 + $0x10] sm:$0xff]  ;;  %v904_v3 = vld [vmem:[%s1636_s3] sm:$0xff]  ;;  %v600_v19 = vld [vmem:[%s1639_s6 + $0x28] sm:$0xff] }
 0x171   : > { %v534_v35 = vld [vmem:[#allocation2 + $0x38] sm:$0xff]  ;;  %1062 = vperm.xlu1 %1060, %v1061_v48   ;;  %v905_v27 = vld [vmem:[%s1638_s5] sm:$0xff]  ;;  %v906_v28 = vld [vmem:[%s1638_s5 + $0x8] sm:$0xff] }
 0x172   : > { %v542_v39 = vmul.f32 0.00390625, %v534_v35  ;;  %v908_v29 = vld [vmem:[%s1638_s5 + $0x18] sm:$0xff]  ;;  %v907_v30 = vld [vmem:[%s1638_s5 + $0x10] sm:$0xff] }
 0x174   : > { %v1050_v45 = vpack.i.bf16 %v542_v39, %v541_v38 }
 0x176   : > { %1051 = vperm.xlu0 %1049, %v1050_v45  }
 0x178   : > { %614 = vperm.xlu2 %1071, %v586_v8  }
 0x179   : > { %1067 = vperm.xlu1 %1060, %v1066_v54  }
 0x17e   : > { %1056 = vperm.xlu0 %1049, %v1055_v53  }
 0x180   : > { %654 = vperm.xlu2 %1071, %v597_v17  }
 0x181   : > { %649 = vperm.xlu1 %1060, %v596_v56  }
 0x186   : > { %644 = vperm.xlu0 %1049, %v595_v55  }
 0x188   : > { %669 = vperm.xlu2 %1071, %v600_v19  }
 0x189   : > { %664 = vperm.xlu1 %1060, %v599_v58  }
 0x18e   : > { %659 = vperm.xlu0 %1049, %v598_v57  }
 0x191   : > { %679 = vperm.xlu1 %1060, %v602_v60  }
 0x196   : > { %674 = vperm.xlu0 %1049, %v601_v59  }
 0x1ca   : > { %v610_v5 = vpop.permute.xlu2 %609 }
 0x1d2   : > { %v615_v22 = vpop.permute.xlu2 %614 }
 0x1da   : > { %v655_v37 = vpop.permute.xlu2 %654 }
 0x1e2   : > { %v670_v52 = vpop.permute.xlu2 %669 }
 0x1e3   : > { %v1063_v6 = vpop.permute.xlu1 %1062 }
 0x1e4   : > { %v1065_v12 = vunpack.i.h.bf16 %v1063_v6  ;;  %v1064_v9 = vunpack.i.l.bf16 %v1063_v6 }
 0x1e6   : > { %v604_v16 = vpack.c.bf16 %v1065_v12, %v1064_v9 }
 0x1e8   : > { %v1052_v61 = vpop.permute.xlu0 %1051 }
 0x1e9   : > { %v1054_v62 = vunpack.i.h.bf16 %v1052_v61  ;;  %v1053_v63 = vunpack.i.l.bf16 %v1052_v61 }
 0x1eb   : > { %v606_v7 = vpack.c.bf16 %v1054_v62, %v1053_v63  ;;  %v1068_v13 = vpop.permute.xlu1 %1067 }
 0x1ec   : > { %v1070_v14 = vunpack.i.h.bf16 %v1068_v13  ;;  %v1069_v15 = vunpack.i.l.bf16 %v1068_v13 }
 0x1ed   : > { %629 = vmatpush.bf16.msra.mxu0 %v606_v7 }
 0x1ee   : > { %v603_v18 = vpack.c.bf16 %v1070_v14, %v1069_v15 }
 0x1f0   : > { %v1057_v10 = vpop.permute.xlu0 %1056 }
 0x1f1   : > { %v1059_v4 = vunpack.i.h.bf16 %v1057_v10  ;;  %v1058_v11 = vunpack.i.l.bf16 %v1057_v10 }
 0x1f3   : > { %v605_v2 = vpack.c.bf16 %v1059_v4, %v1058_v11  ;;  %v650_v32 = vpop.permute.xlu1 %649 }
 0x1f5   : > { %630 = vmatpush.bf16.msra.mxu0 %v605_v2 }
 0x1f8   : > { %v645_v31 = vpop.permute.xlu0 %644 }
 0x1f9   : > { %631 = vmatpush.bf16.msra.mxu0 %v604_v16 }
 0x1fb   : > { %v665_v36 = vpop.permute.xlu1 %664 }
 0x1fd   : > { %632 = vmatpush.bf16.msra.mxu0 %v603_v18 }
 0x200   : > { %878 = vmatmul.msk.bf16.vlgmr.msra.gmra.mxu0 %vm392_vm1, %v904_v3  ;;  %v660_v33 = vpop.permute.xlu0 %659 }
 0x203   : > { %v680_v46 = vpop.permute.xlu1 %679 }
 0x208   : > { %v675_v39 = vpop.permute.xlu0 %674 }
 0x27d   : > { %v634_v20 = vpop.f32.mrf.mxu0 }
 0x27e   : > { %v635_v21 = vadd.f32 %v634_v20, %v610_v5 }
 0x280   : > { %v639_v24 = vmax.f32 %v635_v21, 0.0 }
 0x285   : > { %v636_v23 = vpop.f32.mrf.mxu0 }
 0x286   : > { %v637_v1 = vadd.f32 %v636_v23, %v615_v22 }
 0x288   : > { %v640_v25 = vmax.f32 %v637_v1, 0.0 }
 0x28a   : > { %v641_v26 = vpack.c.bf16 %v640_v25, %v639_v24 }
 0x28c   : > { %722 = vmatpush.bf16.msra.mxu1 %v641_v26  ;;  %934 = vmatpush.bf16.msra.mxu2 %v641_v26 }
 0x28d   : > { %935 = vmatpush.bf16.msra.mxu3 %v641_v26 }
 0x28f   : > { %895 = vmatmul.msk.bf16.vlgmr.msra.gmra.mxu1 %vm702_vm3, %v905_v27  ;;  %896 = vmatmul.msk.bf16.vlgmr.msra.gmra.mxu2 %vm702_vm3, %v906_v28 }
 0x290   : > { %898 = vmatmul.msk.bf16.vlgmr.msra.gmra.mxu3 %vm702_vm3, %v908_v29 }
 0x29f   : > { %897 = vmatmul.msk.bf16.gmra.mxu2 %vm702_vm3, %v907_v30 }
 0x30c   : > { %v724_v34 = vpop.f32.mrf.mxu1 }
 0x30d   : > { %v725_v35 = vadd.f32 %v724_v34, %v645_v31 }
 0x30f   : > { %744 = vst [vmem:[%s1393_s26] sm:$0xff] %v725_v35 }
 0x312   : > { %v729_v38 = vpop.f32.mrf.mxu2 }
 0x313   : > { %v730_v40 = vadd.f32 %v729_v38, %v655_v37  ;;  %v739_v41 = vpop.f32.mrf.mxu3 }
 0x314   : > { %v740_v42 = vadd.f32 %v739_v41, %v675_v39  ;;  %v726_v43 = vpop.f32.mrf.mxu1 }
 0x315   : > { %746 = vst [vmem:[%s1393_s26 + $0x10] sm:$0xff] %v730_v40  ;;  %v727_v44 = vadd.f32 %v726_v43, %v650_v32 }
 0x316   : > { %750 = vst [vmem:[%s1393_s26 + $0x30] sm:$0xff] %v740_v42 }
 0x317   : > { %745 = vst [vmem:[%s1393_s26 + $0x8] sm:$0xff] %v727_v44 }
 0x31a   : > { %v731_v45 = vpop.f32.mrf.mxu2 }
 0x31b   : > { %v732_v47 = vadd.f32 %v731_v45, %v660_v33  ;;  %v741_v48 = vpop.f32.mrf.mxu3 }
 0x31c   : > { %v742_v49 = vadd.f32 %v741_v48, %v680_v46 }
 0x31d   : > { %747 = vst [vmem:[%s1393_s26 + $0x18] sm:$0xff] %v732_v47 }
 0x31e   : > { %751 = vst [vmem:[%s1393_s26 + $0x38] sm:$0xff] %v742_v49 }
 0x322   : > { %v734_v50 = vpop.f32.mrf.mxu2 }
 0x323   : > { %v735_v51 = vadd.f32 %v734_v50, %v665_v36 }
 0x325   : > { %748 = vst [vmem:[%s1393_s26 + $0x20] sm:$0xff] %v735_v51 }
 0x32a   : > { %v736_v53 = vpop.f32.mrf.mxu2 }
 0x32b   : > { %v737_v54 = vadd.f32 %v736_v53, %v670_v52 }
 0x32d   : > { %749 = vst [vmem:[%s1393_s26 + $0x28] sm:$0xff] %v737_v54 }
 0x32e PF: > { %s1663_s29 = sld [smem:[#allocation11_spill]]  ;;  %s765_s12 = sshll.u32 %s1393_s26, 4  ;;  %s766_s12 = int_to_ptr.vmem [resolvable:$true] %s765_s12 }
 0x32f   : > { %s1665_s23 = sld [smem:[#allocation18_spill]]  ;;  %s753_s16 = scalar_lea.sflag [#allocation5], %s311_s8 }
 0x334   : > { %s909_s30 = sshll.u32 %s1663_s29, 6 }
 0x335   : > { %s764_s27 = scalar_lea.hbm %s1665_s23, %s909_s30  ;;  %s1122_s22 = scalar_lea.hbm %s1665_s23, 128 }
 0x336   : > { %s767_s19 = sshll.u32 %s764_s27, 4  ;;  %s768_s19 = int_to_ptr.hbm [resolvable:$true] %s767_s19 }
 0x337   : > { %s1116_s13 = sshra.s32 %s768_s19, 4  ;;  %s1117_s13 = int_to_ptr.hbm [resolvable:$true] %s1116_s13 }
 0x338   : > { %s1118_s15 = scalar_lea.hbm %s1117_s13, 64  ;;  %p1123_p13 = scmp.lt.s32.totalorder %s1117_s13, %s1665_s23 }
 0x339   : > { %p1119_p9 = scmp.ne.s32.totalorder %s1117_s13, %s1118_s15  ;;  %p1124_p0 = scmp.lt.s32.totalorder %s1122_s22, %s1118_s15 }
 0x33b   : > { %p1120_p10 = pnand %p1119_p9, %p1356_p12  ;;  %p1125_p1 = por %p1124_p0, %p1123_p13 }
 0x33d   : > { %p1121_p11 = pneg %p1120_p10 }
 0x33f   : > { %p1126_p4 = pnand %p1125_p1, %p1121_p11 }
 0x341   : > { %1129 = shalt.err (!%p1126_p4)
}
 0x342   : > { %s1232_s8 = smov 128   ;;  %s1233_s26 = smov 8  }
 0x343   : > { %938 = dma.vmem_to_hbm [thread:$0]  (%p1356_p12), %s766_s12, 1024, %s768_s19, %s753_s16, %s1232_s8, %s1232_s8, %s1233_s26  }
 0x344 PF: > { %p949_p5 = scmp.ge.s32.totalorder %s1224_s11, 2  ;;  %s782_s18 = sand.u32 1, %s1184_s24  }
 0x345   : > { %s783_s20 = scalar_lea.sflag [#allocation5], %s782_s18 }
 0x346   : > { %p945_p6 = pnand %p949_p5, %p1369_p2 }
 0x348   : > { %p946_p8 = pneg %p945_p6 }
 0x34a   : > { %1179 = dma.done.wait (%p946_p8), %s783_s20, 1024  }
 0x34b   : > { %1181 = vsyncadd (%p946_p8), %s783_s20, 4294966272  ;;  %s23_s11 = sadd.s32 1, %s1224_s11   ;;  %s1667_s27 = sld [smem:[#allocation9_spill]] }
 0x34c   : > { %p20_p3 = scmp.ge.s32.totalorder %s23_s11, 6   ;;  %s1668_s26 = sld [smem:[#allocation15_spill]] }
 0x34d   : > { %s1669_s14 = sld [smem:[#allocation10_spill]]  ;;  %s1673_s24 = smov %s1188_s25 }
 0x34e   : > { %s1670_s29 = sld [smem:[#allocation16_spill]]  ;;  %s1677_s30 = smov %s1216_s9 }
 0x34f   : > { %s1671_s12 = sld [smem:[#allocation12_spill]]  ;;  %s1678_s8 = smov %s1220_s10 }
 0x350   : > { %s1672_s19 = sld [smem:[#allocation13_spill]] }
 0x351   : > { %s1674_s25 = smov %s1667_s27  ;;  %s1675_s27 = smov %s1200_s28 }
 0x352   :  { %22 = sbr.rel (!%p20_p3) target bundleno = 11 (0xb), region = 101 }
 0x353   : > { %s1676_s28 = smov %s1669_s14 }
 0x355   : > { %s1679_s9 = smov %s1671_s12 }
 0x356   : > { %s1680_s10 = smov %s1672_s19 }
 0x357   :  { %789 = vsyncpa [#allocation4], 1 }
 0x358   :  { %791 = vsyncpa [#allocation4 + $0x1], 1 }
 0x359   :  { %792 = vsyncpa [#allocation5], 1 }
 0x35a   :  { %794 = vsyncpa [#allocation5 + $0x1], 1 }

</bundles_post_ra>
